<compile_context>
chip_gen: v5e
topology: v5e:2x2
jax: 0.10.0
libtpu: 0.0.40
codegen_flags: <defaults>
</compile_context>

<pallas_src>
import functools

import jax
import jax.numpy as jnp
from jax import lax
from jax.experimental import pallas as pl
from jax.experimental.pallas import tpu as pltpu


def conv_bn_relu_pool_kernel(x_ref, w_ref, b_ref, o_ref, *, Ht, W, Cin_p, Cout_p):
    # x_ref: (1, H+2, W+2, Cin_p) bf16 -- full spatially padded image (resident across row tiles)
    # w_ref: (9*Cin_p, Cout_p)    bf16 -- BN-scale-folded conv weight, im2col layout
    # b_ref: (1, Cout_p)          f32  -- folded BN bias
    # o_ref: (1, Ht//2, W//2, Cout_p)
    t = pl.program_id(1)
    row0 = pl.multiple_of(t * Ht, Ht)
    # Halo'd row window for this tile (f32 staging; values are already bf16-quantized).
    xb = x_ref[0, pl.ds(row0, Ht + 2), :, :].astype(jnp.float32)      # (Ht+2, W+2, Cin_p)

    # im2col: 9 shifted taps concatenated on the channel (lane) axis -> ONE K=9*Cin_p matmul.
    taps = [xb[dy:dy + Ht, dx:dx + W, :] for dy in range(3) for dx in range(3)]
    patch = jnp.concatenate(taps, axis=-1).reshape(Ht * W, 9 * Cin_p)

    acc = jnp.dot(patch.astype(jnp.bfloat16), w_ref[...],
                  preferred_element_type=jnp.float32)                  # (Ht*W, Cout_p) f32

    # Folded-BN bias + ReLU (scale already folded into the weights).
    y = jnp.maximum(acc + b_ref[...], 0.0)

    # 2x2 max pool, stride 2.
    y = y.reshape(Ht, W, Cout_p)
    y = jnp.max(y.reshape(Ht // 2, 2, W, Cout_p), axis=1)              # pool rows
    y = jnp.max(y.reshape(Ht // 2, W // 2, 2, Cout_p), axis=2)         # pool cols
    o_ref[0] = y.astype(o_ref.dtype)


def _round_up(x, m):
    return ((x + m - 1) // m) * m


def _pick_row_tile(H):
    # Prefer >=2 row tiles per image (pipelining); tile must be even and divide H.
    for ht in (128, 64, 32, 16, 8, 4, 2):
        if ht < H and H % ht == 0:
            return ht
    return H


def conv_block(x_nchw, w_oihw, bn_scale, bn_bias):
    """ConvBlock forward. x_nchw: (N, Cin, H, W) -> (N, Cout, H//2, W//2)."""
    N, Cin, H, W = x_nchw.shape
    Cout = w_oihw.shape[0]
    assert H % 2 == 0 and W % 2 == 0

    Cin_p = _round_up(Cin, 8)        # clean lane offsets for the tap concat
    Cout_p = _round_up(Cout, 128)    # lane-dense accumulator + unmasked vst output stores
    Ht = _pick_row_tile(H)
    Ho, Wo, nT = H // 2, W // 2, H // Ht

    # ---- wrapper-side glue (layout + folding), kept out of the kernel ----
    x_nhwc = jnp.transpose(x_nchw, (0, 2, 3, 1))
    x_p = jnp.pad(x_nhwc, ((0, 0), (1, 1), (1, 1), (0, Cin_p - Cin))).astype(jnp.bfloat16)

    w_hwio = jnp.transpose(w_oihw, (2, 3, 1, 0)).astype(jnp.float32)          # (3,3,Cin,Cout)
    w_fold = w_hwio * bn_scale.astype(jnp.float32)[None, None, None, :]       # fold BN scale
    w_fold = jnp.pad(w_fold, ((0, 0), (0, 0), (0, Cin_p - Cin), (0, Cout_p - Cout)))
    w2 = w_fold.reshape(9 * Cin_p, Cout_p).astype(jnp.bfloat16)               # im2col layout

    bias2 = jnp.pad(bn_bias.astype(jnp.float32), (0, Cout_p - Cout)).reshape(1, Cout_p)

    kernel = functools.partial(conv_bn_relu_pool_kernel,
                               Ht=Ht, W=W, Cin_p=Cin_p, Cout_p=Cout_p)

    flops = 2 * N * H * W * 9 * Cin * Cout
    bytes_accessed = (N * (H + 2) * (W + 2) * Cin_p * 2        # x (bf16)
                      + 9 * Cin_p * Cout_p * 2                 # weights (bf16)
                      + N * Ho * Wo * Cout_p * 4)              # output (f32)

    out_nhwc = pl.pallas_call(
        kernel,
        out_shape=jax.ShapeDtypeStruct((N, Ho, Wo, Cout_p), x_nchw.dtype),
        grid=(N, nT),
        in_specs=[
            # Full padded image per batch element. Its block index ignores the row-tile axis,
            # so it is DMA'd once per image and reused across all row tiles.
            pl.BlockSpec((1, H + 2, W + 2, Cin_p), lambda n, t: (n, 0, 0, 0)),
            pl.BlockSpec((9 * Cin_p, Cout_p), lambda n, t: (0, 0)),
            pl.BlockSpec((1, Cout_p), lambda n, t: (0, 0)),
        ],
        out_specs=pl.BlockSpec((1, Ht // 2, Wo, Cout_p), lambda n, t: (n, t, 0, 0)),
        compiler_params=pltpu.CompilerParams(
            dimension_semantics=("parallel", "arbitrary"),
            vmem_limit_bytes=32 * 1024 * 1024,
        ),
        cost_estimate=pl.CostEstimate(flops=flops, transcendentals=0,
                                      bytes_accessed=bytes_accessed),
    )(x_p, w2, bias2)

    out = out_nhwc[..., :Cout]
    # TODO(synk): return NHWC directly if the consumer accepts it; this transpose is an extra HBM
    #             round trip kept only to preserve the PyTorch NCHW interface.
    return jnp.transpose(out, (0, 3, 1, 2))


def _reference(x_nchw, w_oihw, bn_scale, bn_bias):
    """Pure-JAX reference mirroring the kernel's bf16-operand / f32-accumulate numerics."""
    w_fold = w_oihw.astype(jnp.float32) * bn_scale.astype(jnp.float32)[:, None, None, None]
    xq = x_nchw.astype(jnp.bfloat16).astype(jnp.float32)
    wq = w_fold.astype(jnp.bfloat16).astype(jnp.float32)
    y = lax.conv_general_dilated(
        xq, wq, window_strides=(1, 1), padding=((1, 1), (1, 1)),
        dimension_numbers=("NCHW", "OIHW", "NCHW"),
        preferred_element_type=jnp.float32,
    )
    y = y + bn_bias.astype(jnp.float32)[None, :, None, None]
    y = jnp.maximum(y, 0.0)
    y = lax.reduce_window(y, -jnp.inf, lax.max,
                          window_dimensions=(1, 1, 2, 2),
                          window_strides=(1, 1, 2, 2),
                          padding="VALID")
    return y


if __name__ == "__main__":
    key = jax.random.PRNGKey(0)
    k_x, k_w, k_g, k_b, k_m, k_v = jax.random.split(key, 6)

    N, Cin, Cout, H, W = 2, 4, 8, 16, 16
    eps = 1e-5

    x = jax.random.normal(k_x, (N, Cin, H, W), dtype=jnp.float32)

    # Deterministic parameter init (shapes from nn.Conv2d / nn.BatchNorm2d).
    fan_in = Cin * 3 * 3
    bound = 1.0 / (fan_in ** 0.5)
    w = jax.random.uniform(k_w, (Cout, Cin, 3, 3), minval=-bound, maxval=bound,
                           dtype=jnp.float32)
    gamma = 1.0 + 0.1 * jax.random.normal(k_g, (Cout,), dtype=jnp.float32)
    beta = 0.1 * jax.random.normal(k_b, (Cout,), dtype=jnp.float32)
    running_mean = 0.1 * jax.random.normal(k_m, (Cout,), dtype=jnp.float32)
    running_var = jnp.abs(jax.random.normal(k_v, (Cout,), dtype=jnp.float32)) + 0.5

    # Fold BN running stats into per-channel scale/bias (inference mode).
    bn_scale = gamma / jnp.sqrt(running_var + eps)
    bn_bias = beta - running_mean * bn_scale

    out = jax.jit(conv_block)(x, w, bn_scale, bn_bias)
    out = jax.block_until_ready(out)

    ref = _reference(x, w, bn_scale, bn_bias)
    assert out.shape == (N, Cout, H // 2, W // 2), out.shape
    max_err = float(jnp.max(jnp.abs(out - ref)))
    assert jnp.allclose(out, ref, atol=1e-3, rtol=1e-3), max_err

    print("KERNEL_OK")
</pallas_src>

<mosaic_0001>
module attributes {stable_mosaic.version = 11 : i64} {
  func.func @conv_bn_relu_pool_kernel(%arg0: i32, %arg1: i32, %arg2: memref<1x18x18x8xbf16, #tpu.memory_space<vmem>>, %arg3: memref<72x128xbf16, #tpu.memory_space<vmem>>, %arg4: memref<1x128xf32, #tpu.memory_space<vmem>>, %arg5: memref<1x4x8x128xf32, #tpu.memory_space<vmem>>) attributes {dimension_semantics = [#tpu.dimension_semantics<parallel>, #tpu.dimension_semantics<arbitrary>], iteration_bounds = array<i64: 2, 2>, scalar_prefetch = 0 : i64, scratch_operands = 0 : i64, tpu.core_type = #tpu.core_type<tc>, window_params = [{transform_indices = @transform_0, window_bounds = array<i64: 1, 18, 18, 8>}, {pipeline_mode = #tpu.pipeline_mode<synchronous>, transform_indices = @transform_1, window_bounds = array<i64: 72, 128>}, {pipeline_mode = #tpu.pipeline_mode<synchronous>, transform_indices = @transform_2, window_bounds = array<i64: 1, 128>}, {transform_indices = @transform_3, window_bounds = array<i64: 1, 4, 8, 128>}]} {
    %c8_i32 = arith.constant 8 : i32
    %0 = arith.muli %arg1, %c8_i32 : i32
    %1 = tpu.assume_multiple %0, 8 : i32
    %c0 = arith.constant 0 : index
    %2 = arith.index_cast %1 : i32 to index
    %c0_0 = arith.constant 0 : index
    %c0_1 = arith.constant 0 : index
    %3 = vector.load %arg2[%c0, %2, %c0_0, %c0_1] : memref<1x18x18x8xbf16, #tpu.memory_space<vmem>>, vector<1x10x18x8xbf16>
    %4 = vector.shape_cast %3 : vector<1x10x18x8xbf16> to vector<10x18x8xbf16>
    %5 = arith.extf %4 : vector<10x18x8xbf16> to vector<10x18x8xf32>
    %6 = vector.extract_strided_slice %5 {offsets = [0, 0, 0], sizes = [8, 16, 8], strides = [1, 1, 1]} : vector<10x18x8xf32> to vector<8x16x8xf32>
    %7 = vector.extract_strided_slice %5 {offsets = [0, 1, 0], sizes = [8, 16, 8], strides = [1, 1, 1]} : vector<10x18x8xf32> to vector<8x16x8xf32>
    %8 = vector.extract_strided_slice %5 {offsets = [0, 2, 0], sizes = [8, 16, 8], strides = [1, 1, 1]} : vector<10x18x8xf32> to vector<8x16x8xf32>
    %9 = vector.extract_strided_slice %5 {offsets = [1, 0, 0], sizes = [8, 16, 8], strides = [1, 1, 1]} : vector<10x18x8xf32> to vector<8x16x8xf32>
    %10 = vector.extract_strided_slice %5 {offsets = [1, 1, 0], sizes = [8, 16, 8], strides = [1, 1, 1]} : vector<10x18x8xf32> to vector<8x16x8xf32>
    %11 = vector.extract_strided_slice %5 {offsets = [1, 2, 0], sizes = [8, 16, 8], strides = [1, 1, 1]} : vector<10x18x8xf32> to vector<8x16x8xf32>
    %12 = vector.extract_strided_slice %5 {offsets = [2, 0, 0], sizes = [8, 16, 8], strides = [1, 1, 1]} : vector<10x18x8xf32> to vector<8x16x8xf32>
    %13 = vector.extract_strided_slice %5 {offsets = [2, 1, 0], sizes = [8, 16, 8], strides = [1, 1, 1]} : vector<10x18x8xf32> to vector<8x16x8xf32>
    %14 = vector.extract_strided_slice %5 {offsets = [2, 2, 0], sizes = [8, 16, 8], strides = [1, 1, 1]} : vector<10x18x8xf32> to vector<8x16x8xf32>
    %15 = tpu.concatenate %6, %7, %8, %9, %10, %11, %12, %13, %14 in 2 : vector<8x16x8xf32>, vector<8x16x8xf32>, vector<8x16x8xf32>, vector<8x16x8xf32>, vector<8x16x8xf32>, vector<8x16x8xf32>, vector<8x16x8xf32>, vector<8x16x8xf32>, vector<8x16x8xf32> -> vector<8x16x72xf32>
    %16 = vector.shape_cast %15 : vector<8x16x72xf32> to vector<128x72xf32>
    %17 = arith.truncf %16 : vector<128x72xf32> to vector<128x72xbf16>
    %c0_2 = arith.constant 0 : index
    %c0_3 = arith.constant 0 : index
    %18 = vector.load %arg3[%c0_2, %c0_3] : memref<72x128xbf16, #tpu.memory_space<vmem>>, vector<72x128xbf16>
    %cst = arith.constant dense<0.000000e+00> : vector<128x128xf32>
    %19 = tpu.matmul %17, %18, %cst {dimension_numbers = #tpu.dot_dimension_numbers<[1], [0], [0], [1], [0, 0, 1, 1], [], []>} : vector<128x72xbf16>, vector<72x128xbf16>, vector<128x128xf32> -> vector<128x128xf32>
    %c0_4 = arith.constant 0 : index
    %c0_5 = arith.constant 0 : index
    %20 = vector.load %arg4[%c0_4, %c0_5] : memref<1x128xf32, #tpu.memory_space<vmem>>, vector<1x128xf32>
    %21 = vector.broadcast %20 : vector<1x128xf32> to vector<128x128xf32>
    %22 = arith.addf %19, %21 : vector<128x128xf32>
    %cst_6 = arith.constant 0.000000e+00 : f32
    %23 = vector.broadcast %cst_6 : f32 to vector<128x128xf32>
    %24 = arith.maximumf %22, %23 : vector<128x128xf32>
    %25 = vector.shape_cast %24 : vector<128x128xf32> to vector<8x16x128xf32>
    %26 = vector.shape_cast %25 : vector<8x16x128xf32> to vector<4x2x16x128xf32>
    %cst_7 = arith.constant dense<0xFF800000> : vector<4x16x128xf32>
    %27 = vector.multi_reduction <maximumf>, %26, %cst_7 [1] : vector<4x2x16x128xf32> to vector<4x16x128xf32>
    %28 = vector.shape_cast %27 : vector<4x16x128xf32> to vector<4x8x2x128xf32>
    %cst_8 = arith.constant dense<0xFF800000> : vector<4x8x128xf32>
    %29 = vector.multi_reduction <maximumf>, %28, %cst_8 [2] : vector<4x8x2x128xf32> to vector<4x8x128xf32>
    %c0_9 = arith.constant 0 : index
    %c0_10 = arith.constant 0 : index
    %c0_11 = arith.constant 0 : index
    %c0_12 = arith.constant 0 : index
    %30 = vector.load %arg5[%c0_9, %c0_10, %c0_11, %c0_12] : memref<1x4x8x128xf32, #tpu.memory_space<vmem>>, vector<1x4x8x128xf32>
    %31 = vector.shape_cast %30 : vector<1x4x8x128xf32> to vector<4x8x128xf32>
    %32 = vector.shape_cast %29 : vector<4x8x128xf32> to vector<1x4x8x128xf32>
    tpu.vector_store %arg5[%c0_9, %c0_10, %c0_11, %c0_12], %32 {strides = array<i32>} : memref<1x4x8x128xf32, #tpu.memory_space<vmem>>, vector<1x4x8x128xf32>,
    return
  }
  func.func @transform_0(%arg0: i32, %arg1: i32) -> (i32, i32, i32, i32) {
    %c0_i32 = arith.constant 0 : i32
    %c0_i32_0 = arith.constant 0 : i32
    %c0_i32_1 = arith.constant 0 : i32
    %c0_i32_2 = arith.constant 0 : i32
    return %arg0, %c0_i32, %c0_i32_0, %c0_i32_1 : i32, i32, i32, i32
  }
  func.func @transform_1(%arg0: i32, %arg1: i32) -> (i32, i32) {
    %c0_i32 = arith.constant 0 : i32
    %c0_i32_0 = arith.constant 0 : i32
    %c0_i32_1 = arith.constant 0 : i32
    return %c0_i32, %c0_i32_0 : i32, i32
  }
  func.func @transform_2(%arg0: i32, %arg1: i32) -> (i32, i32) {
    %c0_i32 = arith.constant 0 : i32
    %c0_i32_0 = arith.constant 0 : i32
    %c0_i32_1 = arith.constant 0 : i32
    return %c0_i32, %c0_i32_0 : i32, i32
  }
  func.func @transform_3(%arg0: i32, %arg1: i32) -> (i32, i32, i32, i32) {
    %c0_i32 = arith.constant 0 : i32
    %c0_i32_0 = arith.constant 0 : i32
    %c0_i32_1 = arith.constant 0 : i32
    return %arg0, %arg1, %c0_i32, %c0_i32_0 : i32, i32, i32, i32
  }
}

</mosaic_0001>

<bundles_post_ra>
// kernel: conv_block.1
= control target key start
LH: loop header
LB: loop body
LE: loop exit
PB: predicated region body
PF: predicated region fallthrough
CT: control target
= control target key end

     0   :  { %s2023_s12 = smov 0   ;;  %s2025_s13 = smov 0   ;;  %s2854_s0 = inlined_call_operand.vmem [shape: bf16[2,18,18,8], index: 0, kind: input, shape index: {}]   ;;  %s2855_s1 = inlined_call_operand.vmem [shape: bf16[72,128], index: 1, kind: input, shape index: {}]   ;;  %s2856_s2 = inlined_call_operand.vmem [shape: f32[1,128], index: 2, kind: input, shape index: {}]   ;;  %s2857_s3 = inlined_call_operand.vmem [shape: f32[2,8,8,128], index: 3, kind: output, shape index: {}]  }
   0x1   :  { %s2027_s14 = smov 0   ;;  %s2029_s15 = smov 0  }
   0x2   :  { %s2031_s16 = smov 0  }
   0x3 LB: > { %s22_s17 = sadd.s32 1, %s1985_s14  ;;  %s25_s18 = sadd.s32 1, %s1989_s15  ;;  %s1993_s16 = sphi %s2031_s16, %s13_s16   ;;  %s1989_s15 = sphi %s2029_s15, %s2862_s15   ;;  %s1985_s14 = sphi %s2027_s14, %s2861_s14   ;;  %s1981_s13 = sphi %s2025_s13, %s2860_s13   ;;  %s1977_s12 = sphi %s2023_s12, %s2859_s12  }
   0x4   : > { %p23_p0 = scmp.ge.s32.totalorder %s22_s17, 2  ;;  %p1507_p1 = scmp.ge.s32.totalorder %s1993_s16, 1 }
   0x5   : > { %p151_p2 = scmp.lt.s32.totalorder %s1993_s16, 5 }
   0x6   : > { %s2864_s17 = smov (%p23_p0, %s22_s17), 0  ;;  %s2866_s18 = smov (!%p23_p0, %s25_s18), %s1989_s15 }
   0x7   : > { %p152_p3 = pnand %p1507_p1, %p151_p2  ;;  %p27_p4 = scmp.ge.s32.totalorder %s2866_s18, 2 }
   0x8   : > { %p179_p5 = scmp.lt.s32.totalorder (!%p152_p3), %s1981_s13, 1  ;;  %s1541_s19 = smul.u32 (!%p152_p3), 96, %s1977_s12 }
   0x9   : > { %s2868_s18 = smov (%p27_p4, %s2866_s18), 0  ;;  %155 = sbr.rel (%p152_p3) target bundleno = 507 (0x1fb), region = 32 }
   0xa   : > { %s1995_s25 = smov (!%p152_p3), 8   ;;  %s1996_s26 = smov (!%p152_p3), 16  }
   0xb   : > { %s1997_s27 = smov (!%p152_p3), 24   ;;  %s1998_s28 = smov (!%p152_p3), 32  }
   0xc   : > { %s1999_s29 = smov (!%p152_p3), 40   ;;  %s2000_s30 = smov (!%p152_p3), 48  }
   0xd   : > { %s2001_s4 = smov (!%p152_p3), 64   ;;  %s2002_s5 = smov (!%p152_p3), 56  }
   0xe   : > { %s2870_s13 = smov (!%p179_p5, %s1981_s13), 1  ;;  %vm283_vm0 = vcmask 1046528   ;;  %vm372_vm1 = vcmask 1045504   ;;  %vm775_vm2 = vcmask 64512   ;;  %vm792_vm3 = vcmask 130048  }
   0xf   : > { %s1585_s20 = smul.u32 216, %s2870_s13  ;;  %vm809_vm4 = vcmask 195584   ;;  %vm984_vm5 = vcmask 1043456   ;;  %vm826_vm6 = vcmask 261120   ;;  %vm843_vm7 = vcmask 326656  }
  0x10   : > { %vm860_vm8 = vcmask 392192   ;;  %vm877_vm9 = vcmask 457728   ;;  %vm894_vm10 = vcmask 523264   ;;  %vm959_vm11 = vcmask 588800  }
  0x11   : > { %s183_s23 = scalar_lea.vmem %s2854_s0, %s1585_s20  ;;  %vm1117_vm12 = vcmask 1041408   ;;  %vm1374_vm13 = vcmask 1041409   ;;  %vm1376_vm14 = vcmask 1042434   ;;  %vm1378_vm15 = vcmask 1043459  }
  0x12   : > { %s2062_s24 = scalar_lea.vmem %s183_s23, %s1541_s19 }
  0x13   : > { %v1567_v0 = vld [vmem:[%s2062_s24 + $0x30] sm:$0xff]   ;;  %v2066_v1 = vld [vmem:[%s2062_s24 + $0x38] sm:$0x1]  ;;  %v2077_v7 = vld [vmem:[%s2062_s24 + $0x20] sm:$0x1] }
  0x14   : > { %v1566_v2 = vld [vmem:[%s2062_s24 + $0x18] sm:$0xff]   ;;  %v2069_v3 = vunpack.c.l.bf16 %v1567_v0  ;;  %v2071_v4 = vunpack.c.h.bf16 %v1567_v0  ;;  %v243_v5 = vunpack.c.l.bf16 %v2066_v1  ;;  %v1547_v8 = vld [vmem:[%s2062_s24] sm:$0xff]   ;;  %v2081_v9 = vld [vmem:[%s2062_s24 + $0x8] sm:$0x1]  ;;  %v237_v11 = vunpack.c.l.bf16 %v2077_v7 }
  0x15   : > { %v2074_v6 = vunpack.c.l.bf16 %v1566_v2  ;;  %v2083_v10 = vunpack.c.h.bf16 %v1566_v2  ;;  %v2086_v12 = vunpack.c.l.bf16 %v1547_v8  ;;  %v2088_v13 = vunpack.c.h.bf16 %v1547_v8  ;;  %v214_v14 = vld [vmem:[%s2062_s24 + $0x3c] sm:$0xff]   ;;  %v2102_v23 = vld [vmem:[%s2062_s24 + $0x44] sm:$0x1]  ;;  %v2115_v33 = vld [vmem:[%s2062_s24 + $0x2c] sm:$0x1] }
  0x16   : > { %v304_v15 = vrot.slane %v2069_v3, 1  ;;  %v305_v16 = vrot.slane %v2071_v4, 1  ;;  %v307_v17 = vrot.slane %v243_v5, 1  ;;  %v297_v20 = vrot.slane %v237_v11, 1  ;;  %v208_v28 = vld [vmem:[%s2062_s24 + $0x24] sm:$0xff]   ;;  %v202_v38 = vld [vmem:[%s2062_s24 + $0xc] sm:$0xff]  }
  0x17   : > { %v294_v18 = vrot.slane %v2074_v6, 1  ;;  %v295_v19 = vrot.slane %v2083_v10, 1  ;;  %v231_v21 = vunpack.c.l.bf16 %v2081_v9  ;;  %v284_v22 = vrot.slane %v2086_v12, 1  ;;  %v2133_v43 = vld [vmem:[%s2062_s24 + $0x14] sm:$0x1]  ;;  %v1568_v8 = vld [vmem:[%s2062_s24 + $0x48] sm:$0xff]  }
  0x18   : > { %v306_v24 = vsel %vm283_vm0, %v304_v15, %v305_v16  ;;  %v308_v25 = vsel %vm283_vm0, %v305_v16, %v307_v17  ;;  %v285_v26 = vrot.slane %v2088_v13, 1  ;;  %v2107_v27 = vunpack.c.l.bf16 %v214_v14  ;;  %v220_v52 = vld [vmem:[%s2062_s24 + $0x54] sm:$0xff]   ;;  %v2157_v57 = vld [vmem:[%s2062_s24 + $0x5c] sm:$0x1]  ;;  %v219_v17 = vld [vmem:[%s2062_s24 + $0x50] sm:$0x1] }
  0x19   : > { %v2110_v29 = vpack.i.bf16 %v308_v25, %v306_v24  ;;  %v296_v30 = vsel %vm283_vm0, %v294_v18, %v295_v19  ;;  %v298_v31 = vsel %vm283_vm0, %v295_v19, %v297_v20  ;;  %v287_v32 = vrot.slane %v231_v21, 1 }
  0x1a   : > { %v2117_v34 = vpack.i.bf16 %v298_v31, %v296_v30  ;;  %v286_v35 = vsel %vm283_vm0, %v284_v22, %v285_v26  ;;  %v2120_v36 = vunpack.c.h.bf16 %v214_v14  ;;  %v246_v37 = vunpack.c.l.bf16 %v2102_v23 }
  0x1b   : > { %1655 = vrot.lane.b32.xlu2 %v2110_v29, %s1995_s25  ;;  %v288_v39 = vsel %vm283_vm0, %v285_v26, %v287_v32  ;;  %v309_v40 = vrot.slane %v2107_v27, 1  ;;  %v2128_v41 = vunpack.c.l.bf16 %v208_v28  ;;  %v2130_v42 = vunpack.c.h.bf16 %v208_v28 }
  0x1c   : > { %1645 = vrot.lane.b32.xlu1 %v2117_v34, %s1995_s25  ;;  %v1634_v44 = vpack.i.bf16 %v288_v39, %v286_v35  ;;  %v310_v45 = vrot.slane %v2120_v36, 1  ;;  %v312_v46 = vrot.slane %v246_v37, 1  ;;  %v240_v47 = vunpack.c.l.bf16 %v2115_v33 }
  0x1d   : > { %v299_v48 = vrot.slane %v2128_v41, 1  ;;  %v300_v49 = vrot.slane %v2130_v42, 1  ;;  %v2143_v50 = vunpack.c.l.bf16 %v202_v38  ;;  %v2145_v51 = vunpack.c.h.bf16 %v202_v38 }
  0x1e   : > { %1635 = vrot.lane.b32.xlu0 %v1634_v44, %s1995_s25  ;;  %v2150_v53 = vsel %vm283_vm0, %v309_v40, %v310_v45  ;;  %v2153_v54 = vsel %vm283_vm0, %v310_v45, %v312_v46  ;;  %v302_v55 = vrot.slane %v240_v47, 1  ;;  %v234_v56 = vunpack.c.l.bf16 %v2133_v43 }
  0x1f   : > { %v2161_v58 = vpack.i.bf16 %v2153_v54, %v2150_v53  ;;  %v2164_v59 = vsel %vm283_vm0, %v299_v48, %v300_v49  ;;  %v289_v60 = vrot.slane %v2143_v50, 1  ;;  %v290_v61 = vrot.slane %v2145_v51, 1 }
  0x20   : > { %v2169_v62 = vsel %vm283_vm0, %v300_v49, %v302_v55  ;;  %v292_v63 = vrot.slane %v234_v56, 1  ;;  %v2171_v0 = vunpack.c.l.bf16 %v220_v52  ;;  %v2173_v2 = vunpack.c.h.bf16 %v220_v52 }
  0x21   : > { %v2178_v9 = vpack.i.bf16 %v2169_v62, %v2164_v59  ;;  %v291_v14 = vsel %vm283_vm0, %v289_v60, %v290_v61  ;;  %v252_v15 = vunpack.c.l.bf16 %v2157_v57  ;;  %v373_v16 = vrot.slane %v2086_v12, 2 }
  0x22   : > { %v293_v18 = vsel %vm283_vm0, %v290_v61, %v292_v63  ;;  %v319_v19 = vrot.slane %v2171_v0, 1  ;;  %v320_v20 = vrot.slane %v2173_v2, 1  ;;  %v374_v22 = vrot.slane %v2088_v13, 2 }
  0x23   : > { %1660 = vrot.lane.b32.xlu2 %v2161_v58, %s1995_s25  ;;  %v2190_v24 = vpack.i.bf16 %v293_v18, %v291_v14  ;;  %v322_v25 = vrot.slane %v252_v15, 1  ;;  %v376_v26 = vrot.slane %v231_v21, 2  ;;  %v2194_v28 = vunpack.c.l.bf16 %v1568_v8 }
  0x24   : > { %1650 = vrot.lane.b32.xlu1 %v2178_v9, %s1995_s25  ;;  %v2199_v30 = vsel %vm283_vm0, %v319_v19, %v320_v20  ;;  %v375_v31 = vsel %vm372_vm1, %v373_v16, %v374_v22  ;;  %v2202_v32 = vunpack.c.h.bf16 %v1568_v8  ;;  %v249_v33 = vunpack.c.l.bf16 %v219_v17 }
  0x25   : > { %v2205_v35 = vsel %vm283_vm0, %v320_v20, %v322_v25  ;;  %v377_v38 = vsel %vm372_vm1, %v374_v22, %v376_v26  ;;  %v314_v21 = vrot.slane %v2194_v28, 1  ;;  %v388_v45 = vrot.slane %v2128_v41, 2 }
  0x26   : > { %1640 = vrot.lane.b32.xlu0 %v2190_v24, %s1995_s25  ;;  %v315_v39 = vrot.slane %v2202_v32, 1  ;;  %v317_v40 = vrot.slane %v249_v33, 1  ;;  %v2214_v43 = vpack.i.bf16 %v2205_v35, %v2199_v30  ;;  %v1674_v44 = vpack.i.bf16 %v377_v38, %v375_v31 }
  0x27   : > { %v389_v49 = vrot.slane %v2130_v42, 2  ;;  %v391_v52 = vrot.slane %v240_v47, 2  ;;  %v383_v55 = vrot.slane %v2074_v6, 2  ;;  %v384_v60 = vrot.slane %v2083_v10, 2 }
  0x28   : > { %v316_v46 = vsel %vm283_vm0, %v314_v21, %v315_v39  ;;  %v318_v48 = vsel %vm283_vm0, %v315_v39, %v317_v40  ;;  %v386_v61 = vrot.slane %v237_v11, 2  ;;  %v378_v8 = vrot.slane %v2143_v50, 2 }
  0x29   : > { %v2224_v63 = vpack.i.bf16 %v318_v48, %v316_v46  ;;  %v379_v14 = vrot.slane %v2145_v51, 2  ;;  %v381_v16 = vrot.slane %v234_v56, 2  ;;  %v390_v47 = vsel %vm372_vm1, %v388_v45, %v389_v49 }
  0x2a   : > { %v392_v17 = vsel %vm372_vm1, %v389_v49, %v391_v52  ;;  %v385_v7 = vsel %vm372_vm1, %v383_v55, %v384_v60  ;;  %v387_v11 = vsel %vm372_vm1, %v384_v60, %v386_v61  ;;  %v403_v22 = vrot.slane %v2194_v28, 2 }
  0x2b   : > { %1675 = vrot.lane.b32.xlu2 %v1674_v44, %s1996_s26  ;;  %v2237_v18 = vpack.i.bf16 %v392_v17, %v390_v47  ;;  %v380_v19 = vsel %vm372_vm1, %v378_v8, %v379_v14  ;;  %v382_v56 = vsel %vm372_vm1, %v379_v14, %v381_v16  ;;  %v2241_v20 = vpack.i.bf16 %v387_v11, %v385_v7  ;;  %v1569_v7 = vld [vmem:[%s2062_s24 + $0x60] sm:$0xff]  }
  0x2c   : > { %1670 = vrot.lane.b32.xlu1 %v2214_v43, %s1995_s25  ;;  %v404_v25 = vrot.slane %v2202_v32, 2  ;;  %v406_v26 = vrot.slane %v249_v33, 2  ;;  %v398_v31 = vrot.slane %v2107_v27, 2  ;;  %v399_v38 = vrot.slane %v2120_v36, 2 }
  0x2d   : > { %v401_v21 = vrot.slane %v246_v37, 2  ;;  %v2249_v39 = vpack.i.bf16 %v382_v56, %v380_v19  ;;  %v393_v40 = vrot.slane %v2069_v3, 2  ;;  %v394_v44 = vrot.slane %v2071_v4, 2 }
  0x2e   : > { %1665 = vrot.lane.b32.xlu0 %v2224_v63, %s1995_s25  ;;  %v396_v45 = vrot.slane %v243_v5, 2  ;;  %v405_v33 = vsel %vm372_vm1, %v403_v22, %v404_v25  ;;  %v407_v23 = vsel %vm372_vm1, %v404_v25, %v406_v26  ;;  %v400_v37 = vsel %vm372_vm1, %v398_v31, %v399_v38  ;;  %s1509_s25 = sshll.u32 %s1977_s12, 2 }
  0x2f   : > { %v402_v46 = vsel %vm372_vm1, %v399_v38, %v401_v21  ;;  %v2265_v48 = vpack.i.bf16 %v407_v23, %v405_v33  ;;  %v395_v49 = vsel %vm372_vm1, %v393_v40, %v394_v44  ;;  %v408_v55 = vrot.slane %v2171_v0, 2  ;;  %v225_v40 = vld [vmem:[%s2062_s24 + $0x68] sm:$0x1]  ;;  %p2749_p6 = scmp.lt.s32.totalorder %s1509_s25, 7 }
  0x30   : > { %v397_v1 = vsel %vm372_vm1, %v394_v44, %v396_v45  ;;  %v2269_v5 = vpack.i.bf16 %v402_v46, %v400_v37  ;;  %v409_v60 = vrot.slane %v2173_v2, 2  ;;  %v411_v61 = vrot.slane %v252_v15, 2 }
  0x31   : > { %v2271_v52 = vpack.i.bf16 %v397_v1, %v395_v49  ;;  %v2285_v8 = vpack.i.bf16 %v2083_v10, %v2074_v6  ;;  %v1714_v47 = vpack.i.bf16 %v2145_v51, %v2143_v50  ;;  %v2298_v57 = vpack.i.bf16 %v2120_v36, %v2107_v27  ;;  %s2872_s25 = smov (!%p2749_p6, %s1509_s25), 7 }
  0x32   : > { %v410_v14 = vsel %vm372_vm1, %v408_v55, %v409_v60  ;;  %v412_v16 = vsel %vm372_vm1, %v409_v60, %v411_v61  ;;  %v1729_v15 = vpack.i.bf16 %v2071_v4, %v2069_v3  ;;  %v2305_v11 = vpack.i.bf16 %v2130_v42, %v2128_v41 }
  0x33   : > { %1690 = vrot.lane.b32.xlu2 %v2237_v18, %s1996_s26  ;;  %v2291_v17 = vpack.i.bf16 %v412_v16, %v410_v14  ;;  %v1564_v19 = vunpack.c.l.bf16 %v1569_v7  ;;  %v1565_v56 = vunpack.c.h.bf16 %v1569_v7  ;;  %v2311_v25 = vpack.i.bf16 %v2173_v2, %v2171_v0  ;;  %v226_v16 = vld [vmem:[%s2062_s24 + $0x6c] sm:$0xff]  }
  0x34   : > { %1685 = vrot.lane.b32.xlu1 %v2241_v20, %s1996_s26  ;;  %v1739_v26 = vpack.i.bf16 %v2202_v32, %v2194_v28  ;;  %v1764_v31 = vpack.i.bf16 %v2150_v53, %v2164_v59  ;;  %v1774_v38 = vpack.i.bf16 %v2169_v62, %v2205_v35  ;;  %v1769_v21 = vpack.i.bf16 %v2199_v30, %v2153_v54 }
  0x35   : > { %v1749_v22 = vpack.i.bf16 %v1565_v56, %v1564_v19  ;;  %v255_v53 = vunpack.c.l.bf16 %v225_v40  ;;  %v512_v59 = vrot.slane %v1564_v19, 1  ;;  %v513_v44 = vrot.slane %v1565_v56, 1 }
  0x36   : > { %1680 = vrot.lane.b32.xlu0 %v2249_v39, %s1996_s26  ;;  %v565_v30 = vrot.slane %v1564_v19, 2  ;;  %v566_v35 = vrot.slane %v1565_v56, 2  ;;  %v256_v56 = vunpack.c.l.bf16 %v226_v16 }
  0x37   : > { %v515_v45 = vrot.slane %v255_v53, 1  ;;  %v514_v54 = vsel %vm283_vm0, %v512_v59, %v513_v44  ;;  %v568_v33 = vrot.slane %v255_v53, 2 }
  0x38   : > { %v567_v37 = vsel %vm372_vm1, %v565_v30, %v566_v35 }
  0x39   : > { %v516_v62 = vsel %vm283_vm0, %v513_v44, %v515_v45  ;;  %v569_v46 = vsel %vm372_vm1, %v566_v35, %v568_v33  ;;  %v669_v45 = vrot.slane %v256_v56, 1 }
  0x3a   : > { %v1814_v49 = vpack.i.bf16 %v569_v46, %v567_v37 }
  0x3b   : > { %1705 = vrot.lane.b32.xlu2 %v2265_v48, %s1996_s26 }
  0x3c   : > { %1700 = vrot.lane.b32.xlu1 %v2269_v5, %s1996_s26 }
  0x3e   : > { %1695 = vrot.lane.b32.xlu0 %v2271_v52, %s1996_s26 }
  0x43   : > { %1720 = vrot.lane.b32.xlu2 %v2285_v8, %s1997_s27 }
  0x44   : > { %1715 = vrot.lane.b32.xlu1 %v1714_v47, %s1997_s27 }
  0x46   : > { %1710 = vrot.lane.b32.xlu0 %v2291_v17, %s1996_s26 }
  0x4b   : > { %1735 = vrot.lane.b32.xlu2 %v2298_v57, %s1997_s27 }
  0x4c   : > { %1730 = vrot.lane.b32.xlu1 %v1729_v15, %s1997_s27 }
  0x4e   : > { %1725 = vrot.lane.b32.xlu0 %v2305_v11, %s1997_s27 }
  0x53   : > { %1750 = vrot.lane.b32.xlu2 %v1749_v22, %s1997_s27 }
  0x54   : > { %1745 = vrot.lane.b32.xlu1 %v2311_v25, %s1997_s27 }
  0x56   : > { %1740 = vrot.lane.b32.xlu0 %v1739_v26, %s1997_s27  ;;  %s1510_s27 = sshll.u32 %s2870_s13, 3 }
  0x57   : > { %s190_s12 = sadd.s32 %s1510_s27, %s2872_s25 }
  0x58   : > { %s1511_s13 = sshll.u32 %s190_s12, 3 }
  0x5b   : > { %1765 = vrot.lane.b32.xlu2 %v1764_v31, %s1998_s28 }
  0x5c   : > { %1760 = vrot.lane.b32.xlu1 %v2117_v34, %s1998_s28 }
  0x5e   : > { %1755 = vrot.lane.b32.xlu0 %v2190_v24, %s1998_s28  ;;  %v1804_v24 = vpack.i.bf16 %v516_v62, %v514_v54 }
  0x63   : > { %1780 = vrot.lane.b32.xlu2 %v2269_v5, %s1999_s29 }
  0x64   : > { %1775 = vrot.lane.b32.xlu1 %v1774_v38, %s1998_s28 }
  0x66   : > { %1770 = vrot.lane.b32.xlu0 %v1769_v21, %s1998_s28 }
  0x6b   : > { %1795 = vrot.lane.b32.xlu2 %v1749_v22, %s2000_s30  ;;  %v257_v22 = vunpack.c.h.bf16 %v226_v16 }
  0x6c   : > { %1790 = vrot.lane.b32.xlu1 %v1739_v26, %s2000_s30 }
  0x6d   : > { %v1884_v59 = vpack.i.bf16 %v257_v22, %v256_v56  ;;  %v670_v54 = vrot.slane %v257_v22, 1  ;;  %v723_v16 = vrot.slane %v257_v22, 2 }
  0x6e   : > { %1785 = vrot.lane.b32.xlu0 %v2291_v17, %s1999_s29 }
  0x73   : > { %1810 = vrot.lane.b32.xlu2 %v2265_v48, %s2001_s4 }
  0x74   : > { %1805 = vrot.lane.b32.xlu1 %v1804_v24, %s2002_s5 }
  0x75   : > { %v2341_v23 = vpop.permute.xlu2 %1655 }
  0x76   : > { %1800 = vrot.lane.b32.xlu0 %v2224_v63, %s2002_s5 }
  0x7b   : > { %1825 = vrot.lane.b32.xlu2 %v2237_v18, %s1999_s29 }
  0x7c   : > { %1820 = vrot.lane.b32.xlu1 %v2249_v39, %s1999_s29 }
  0x7d   : > { %v2351_v1 = vpop.permute.xlu2 %1660 }
  0x7e   : > { %1815 = vrot.lane.b32.xlu0 %v1814_v49, %s2001_s4 }
  0x83   : > { %1840 = vrot.lane.b32.xlu2 %v2117_v34, %s2002_s5 }
  0x84   : > { %1835 = vrot.lane.b32.xlu1 %v1729_v15, %s2000_s30 }
  0x85   : > { %v1676_v55 = vpop.permute.xlu2 %1675 }
  0x86   : > { %1830 = vrot.lane.b32.xlu0 %v2285_v8, %s2000_s30  ;;  %v1678_v34 = vunpack.i.h.bf16 %v1676_v55  ;;  %v1677_v61 = vunpack.i.l.bf16 %v1676_v55  ;;  %v228_v8 = vld [vmem:[%s2062_s24 + $0x74] sm:$0x1] }
  0x87   : > { %v258_v26 = vunpack.c.l.bf16 %v228_v8 }
  0x89   : > { %v672_v62 = vrot.slane %v258_v26, 1 }
  0x8b   : > { %1855 = vrot.lane.b32.xlu2 %v2271_v52, %s2001_s4 }
  0x8c   : > { %1850 = vrot.lane.b32.xlu1 %v2241_v20, %s2001_s4 }
  0x8d   : > { %v1691_v39 = vpop.permute.xlu2 %1690 }
  0x8e   : > { %1845 = vrot.lane.b32.xlu0 %v2110_v29, %s2002_s5  ;;  %v2365_v60 = vpop.permute.xlu1 %1645  ;;  %v1692_v40 = vunpack.i.l.bf16 %v1691_v39 }
  0x90   : > { %v1636_v14 = vpop.permute.xlu0 %1635 }
  0x91   : > { %v1638_v47 = vunpack.i.h.bf16 %v1636_v14  ;;  %v1637_v15 = vunpack.i.l.bf16 %v1636_v14  ;;  %v722_v14 = vrot.slane %v256_v56, 2 }
  0x93   : > { %v777_v7 = vsel %vm775_vm2, %v2088_v13, %v1638_v47  ;;  %v776_v19 = vsel %vm775_vm2, %v2086_v12, %v1637_v15  ;;  %1870 = vrot.lane.b32.xlu2 %v2265_v48, %s1999_s29  ;;  %v1693_v13 = vunpack.i.h.bf16 %v1691_v39  ;;  %v673_v39 = vsel %vm283_vm0, %v670_v54, %v672_v62 }
  0x94   : > { %1865 = vrot.lane.b32.xlu1 %v1804_v24, %s1998_s28  ;;  %v2377_v31 = vsel %vm792_vm3, %v776_v19, %v1677_v61  ;;  %v2380_v38 = vsel %vm792_vm3, %v777_v7, %v1678_v34  ;;  %v1647_v47 = vunpack.i.l.bf16 %v2365_v60  ;;  %v724_v8 = vsel %vm372_vm1, %v722_v14, %v723_v16 }
  0x95   : > { %v2382_v21 = vpop.permute.xlu2 %1705 }
  0x96   : > { %1860 = vrot.lane.b32.xlu0 %v2224_v63, %s1998_s28  ;;  %v1651_v12 = vpop.permute.xlu1 %1650 }
  0x97   : > { %v1653_v48 = vunpack.i.h.bf16 %v1651_v12  ;;  %v1652_v53 = vunpack.i.l.bf16 %v1651_v12 }
  0x98   : > { %v1641_v44 = vpop.permute.xlu0 %1640 }
  0x99   : > { %v783_v24 = vsel %vm775_vm2, %v2130_v42, %v1653_v48  ;;  %v782_v30 = vsel %vm775_vm2, %v2128_v41, %v1652_v53  ;;  %v1643_v35 = vunpack.i.h.bf16 %v1641_v44  ;;  %v1642_v33 = vunpack.i.l.bf16 %v1641_v44 }
  0x9a   : > { %v2391_v37 = vsel %vm792_vm3, %v782_v30, %v1692_v40  ;;  %v2394_v63 = vsel %vm792_vm3, %v783_v24, %v1693_v13  ;;  %v671_v42 = vsel %vm283_vm0, %v669_v45, %v670_v54  ;;  %vm1380_vm0 = vcmask 1044484  }
  0x9b   : > { %v779_v46 = vsel %vm775_vm2, %v2145_v51, %v1643_v35  ;;  %v778_v55 = vsel %vm775_vm2, %v2143_v50, %v1642_v33  ;;  %1885 = vrot.lane.b32.xlu2 %v1884_v59, %s2000_s30  ;;  %v1894_v51 = vpack.i.bf16 %v673_v39, %v671_v42  ;;  %v725_v50 = vrot.slane %v258_v26, 2 }
  0x9c   : > { %1880 = vrot.lane.b32.xlu1 %v2311_v25, %s2000_s30  ;;  %v1648_v25 = vunpack.i.h.bf16 %v2365_v60  ;;  %v780_v60 = vsel %vm775_vm2, %v2074_v6, %v1647_v47  ;;  %v1663_v6 = vunpack.i.h.bf16 %v2351_v1 }
  0x9d   : > { %v1721_v41 = vpop.permute.xlu2 %1720  ;;  %v726_v7 = vsel %vm372_vm1, %v723_v16, %v725_v50  ;;  %vm1382_vm1 = vcmask 1045509  }
  0x9e   : > { %1875 = vrot.lane.b32.xlu0 %v1814_v49, %s1999_s29  ;;  %v2406_v34 = vpop.permute.xlu1 %1670  ;;  %v1723_v22 = vunpack.i.h.bf16 %v1721_v41  ;;  %v1722_v26 = vunpack.i.l.bf16 %v1721_v41  ;;  %v1904_v53 = vpack.i.bf16 %v726_v7, %v724_v8  ;;  %v927_v41 = vld [vmem:[%s2855_s1 + $0x20] sm:$0xf] }
  0xa0   : > { %v2408_v61 = vpop.permute.xlu0 %1665 }
  0xa3   : > { %1900 = vrot.lane.b32.xlu2 %v2291_v17, %s2001_s4  ;;  %v781_v17 = vsel %vm775_vm2, %v2083_v10, %v1648_v25  ;;  %v1662_v10 = vunpack.i.l.bf16 %v2351_v1 }
  0xa4   : > { %1895 = vrot.lane.b32.xlu1 %v1894_v51, %s2002_s5 }
  0xa5   : > { %v2415_v15 = vpop.permute.xlu2 %1735  ;;  %v786_v1 = vsel %vm775_vm2, %v2107_v27, %v1662_v10 }
  0xa6   : > { %1890 = vrot.lane.b32.xlu0 %v2214_v43, %s2002_s5  ;;  %v1686_v49 = vpop.permute.xlu1 %1685 }
  0xa7   : > { %v1688_v19 = vunpack.i.h.bf16 %v1686_v49  ;;  %v1687_v56 = vunpack.i.l.bf16 %v1686_v49 }
  0xa8   : > { %v1681_v13 = vpop.permute.xlu0 %1680 }
  0xa9   : > { %v2426_v40 = vsel %vm792_vm3, %v780_v60, %v1687_v56  ;;  %v2429_v43 = vsel %vm792_vm3, %v781_v17, %v1688_v19  ;;  %v1683_v12 = vunpack.i.h.bf16 %v1681_v13  ;;  %v1682_v48 = vunpack.i.l.bf16 %v1681_v13 }
  0xab   : > { %v795_v59 = vsel %vm792_vm3, %v778_v55, %v1682_v48  ;;  %v796_v44 = vsel %vm792_vm3, %v779_v46, %v1683_v12  ;;  %1915 = vrot.lane.b32.xlu2 %v2241_v20, %s1999_s29  ;;  %v787_v20 = vsel %vm775_vm2, %v2120_v36, %v1663_v6  ;;  %v1673_v55 = vunpack.i.h.bf16 %v2406_v34 }
  0xac   : > { %1910 = vrot.lane.b32.xlu1 %v2110_v29, %s1998_s28  ;;  %v2440_v45 = vsel %vm809_vm4, %v795_v59, %v1722_v26  ;;  %v2443_v54 = vsel %vm809_vm4, %v796_v44, %v1723_v22  ;;  %v1672_v36 = vunpack.i.l.bf16 %v2406_v34 }
  0xad   : > { %v1751_v62 = vpop.permute.xlu2 %1750  ;;  %v791_v47 = vsel %vm775_vm2, %v2173_v2, %v1673_v55  ;;  %v1657_v55 = vunpack.i.l.bf16 %v2341_v23 }
  0xae   : > { %1905 = vrot.lane.b32.xlu0 %v1904_v53, %s2001_s4  ;;  %v1701_v24 = vpop.permute.xlu1 %1700  ;;  %v1753_v14 = vunpack.i.h.bf16 %v1751_v62  ;;  %v1752_v16 = vunpack.i.l.bf16 %v1751_v62  ;;  %v790_v49 = vsel %vm775_vm2, %v2171_v0, %v1672_v36  ;;  %v1545_v0 = vld [vmem:[%s2855_s1 + $0x18] sm:$0xff]  ;;  %v1542_v53 = vld [vmem:[%s2855_s1] sm:$0xff]  ;;  %v1667_v36 = vunpack.i.l.bf16 %v2408_v61 }
  0xaf   : > { %v1703_v30 = vunpack.i.h.bf16 %v1701_v24  ;;  %v1702_v35 = vunpack.i.l.bf16 %v1701_v24 }
  0xb0   : > { %v2450_v33 = vpop.permute.xlu0 %1695 }
  0xb1   : > { %v2453_v29 = vsel %vm792_vm3, %v787_v20, %v1703_v30  ;;  %v2456_v46 = vsel %vm792_vm3, %v786_v1, %v1702_v35 }
  0xb3   : > { %1930 = vrot.lane.b32.xlu2 %v2298_v57, %s2000_s30  ;;  %v949_v57 = vunpack.c.l.b16 %v927_v41  ;;  %v1698_v41 = vunpack.i.h.bf16 %v2450_v33 }
  0xb4   : > { %1925 = vrot.lane.b32.xlu1 %v2305_v11, %s2000_s30  ;;  %s2781_s30 = scalar_lea.vmem %s2857_s3, %s1511_s13 }
  0xb5   : > { %v2469_v51 = vpop.permute.xlu2 %1765  ;;  %v954_v8 = vpack.c.b16 %v949_v57, %v949_v57  ;;  %v784_v57 = vsel %vm775_vm2, %v2069_v3, %v1657_v55 }
  0xb6   : > { %1920 = vrot.lane.b32.xlu0 %v2271_v52, %s1999_s29  ;;  %v1716_v27 = vpop.permute.xlu1 %1715 }
  0xb7   : > { %v1718_v42 = vunpack.i.h.bf16 %v1716_v27  ;;  %v1717_v39 = vunpack.i.l.bf16 %v1716_v27  ;;  %v1697_v27 = vunpack.i.l.bf16 %v2450_v33  ;;  %v1738_v33 = vunpack.i.h.bf16 %v2415_v15 }
  0xb8   : > { %v1711_v11 = vpop.permute.xlu0 %1710 }
  0xb9   : > { %v2473_v50 = vsel %vm809_vm4, %v2377_v31, %v1717_v39  ;;  %v2477_v52 = vsel %vm809_vm4, %v2380_v38, %v1718_v42  ;;  %v1713_v34 = vunpack.i.h.bf16 %v1711_v11  ;;  %v1712_v25 = vunpack.i.l.bf16 %v1711_v11 }
  0xba   : > { %v986_v31 = vsel %vm984_vm5, %v954_v8, 0 }
  0xbb   : > { %v808_v7 = vsel %vm792_vm3, %v791_v47, %v1713_v34  ;;  %v807_v19 = vsel %vm792_vm3, %v790_v49, %v1712_v25  ;;  %1945 = vrot.lane.b32.xlu2 %v2237_v18, %s2001_s4  ;;  %1571 = vmatpush.bf16.msra.mxu2 %v986_v31  ;;  %v801_v34 = vsel %vm792_vm3, %v784_v57, %v1697_v27 }
  0xbc   : > { %1940 = vrot.lane.b32.xlu1 %v2161_v58, %s2002_s5  ;;  %v2490_v38 = vsel %vm809_vm4, %v807_v19, %v1752_v16  ;;  %v2493_v2 = vsel %vm809_vm4, %v808_v7, %v1753_v14  ;;  %1572 = vmatpush.bf16.msra.mxu3 %v986_v31  ;;  %v1708_v14 = vunpack.i.h.bf16 %v2382_v21  ;;  %v1737_v16 = vunpack.i.l.bf16 %v2415_v15 }
  0xbd   : > { %991 = vmatpush.bf16.msra.mxu0 %v986_v31  ;;  %1570 = vmatpush.bf16.msra.mxu1 %v986_v31  ;;  %v2510_v26 = vpop.permute.xlu2 %1780 }
  0xbe   : > { %1935 = vrot.lane.b32.xlu0 %v2178_v9, %s2002_s5  ;;  %v1731_v18 = vpop.permute.xlu1 %1730  ;;  %v1544_v9 = vld [vmem:[%s2855_s1 + $0x10] sm:$0xff]  ;;  %v818_v49 = vsel %vm809_vm4, %v801_v34, %v1737_v16  ;;  %v1783_v8 = vunpack.i.h.bf16 %v2510_v26 }
  0xbf   : > { %v1733_v56 = vunpack.i.h.bf16 %v1731_v18  ;;  %v1732_v58 = vunpack.i.l.bf16 %v1731_v18  ;;  %1574 = vmatpush.bf16.msra.mxu2 %v1545_v0 }
  0xc0   : > { %v2500_v17 = vpop.permute.xlu0 %1725  ;;  %1575 = vmatpush.bf16.msra.mxu3 %v1545_v0 }
  0xc1   : > { %v2504_v60 = vsel %vm809_vm4, %v2391_v37, %v1732_v58  ;;  %v2508_v22 = vsel %vm809_vm4, %v2394_v63, %v1733_v56  ;;  %992 = vmatpush.bf16.msra.mxu0 %v1545_v0  ;;  %1573 = vmatpush.bf16.msra.mxu1 %v1545_v0  ;;  %v1543_v37 = vld [vmem:[%s2855_s1 + $0x8] sm:$0xff] }
  0xc3   : > { %1577 = vmatpush.bf16.msra.mxu2 %v1544_v9 }
  0xc4   : > { %1578 = vmatpush.bf16.msra.mxu3 %v1544_v9 }
  0xc5   : > { %993 = vmatpush.bf16.msra.mxu0 %v1544_v9  ;;  %1576 = vmatpush.bf16.msra.mxu1 %v1544_v9  ;;  %v2525_v59 = vpop.permute.xlu2 %1795 }
  0xc6   : > { %1950 = vrot.lane.b32.xlu0 %v2269_v5, %s2001_s4  ;;  %v2520_v63 = vpop.permute.xlu1 %1745  ;;  %v1798_v27 = vunpack.i.h.bf16 %v2525_v59  ;;  %v1797_v57 = vunpack.i.l.bf16 %v2525_v59 }
  0xc7   : > { %1580 = vmatpush.bf16.msra.mxu2 %v1543_v37  ;;  %v1748_v58 = vunpack.i.h.bf16 %v2520_v63  ;;  %v1747_v9 = vunpack.i.l.bf16 %v2520_v63 }
  0xc8   : > { %v1741_v13 = vpop.permute.xlu0 %1740  ;;  %1581 = vmatpush.bf16.msra.mxu3 %v1543_v37 }
  0xc9   : > { %v1743_v12 = vunpack.i.h.bf16 %v1741_v13  ;;  %v1742_v48 = vunpack.i.l.bf16 %v1741_v13  ;;  %994 = vmatpush.bf16.msra.mxu0 %v1543_v37  ;;  %1579 = vmatpush.bf16.msra.mxu1 %v1543_v37 }
  0xcb   : > { %v2529_v44 = vsel %vm809_vm4, %v2453_v29, %v1743_v12  ;;  %v2533_v5 = vsel %vm809_vm4, %v2456_v46, %v1742_v48  ;;  %1583 = vmatpush.bf16.msra.mxu2 %v1542_v53  ;;  %v1658_v46 = vunpack.i.h.bf16 %v2341_v23  ;;  %v1707_v23 = vunpack.i.l.bf16 %v2382_v21 }
  0xcc   : > { %1584 = vmatpush.bf16.msra.mxu3 %v1542_v53  ;;  %v1782_v21 = vunpack.i.l.bf16 %v2510_v26 }
  0xcd   : > { %995 = vmatpush.bf16.msra.mxu0 %v1542_v53  ;;  %1582 = vmatpush.bf16.msra.mxu1 %v1542_v53  ;;  %v2545_v20 = vpop.permute.xlu2 %1810  ;;  %v785_v42 = vsel %vm775_vm2, %v2071_v4, %v1658_v46  ;;  %v1768_v4 = vunpack.i.h.bf16 %v2469_v51 }
  0xce   : > { %v1761_v6 = vpop.permute.xlu1 %1760  ;;  %v802_v3 = vsel %vm792_vm3, %v785_v42, %v1698_v41  ;;  %v1813_v37 = vunpack.i.h.bf16 %v2545_v20  ;;  %v1812_v26 = vunpack.i.l.bf16 %v2545_v20 }
  0xcf   : > { %v1763_v10 = vunpack.i.h.bf16 %v1761_v6  ;;  %v1762_v62 = vunpack.i.l.bf16 %v1761_v6  ;;  %v835_v15 = vsel %vm826_vm6, %v818_v49, %v1768_v4  ;;  %v819_v19 = vsel %vm809_vm4, %v802_v3, %v1738_v33 }
  0xd0   : > { %v2535_v24 = vpop.permute.xlu0 %1755  ;;  %v852_v56 = vsel %vm843_vm7, %v835_v15, %v1782_v21 }
  0xd1   : > { %v2539_v30 = vsel %vm826_vm6, %v2440_v45, %v1762_v62  ;;  %v2543_v35 = vsel %vm826_vm6, %v2443_v54, %v1763_v10  ;;  %v1668_v45 = vunpack.i.h.bf16 %v2408_v61  ;;  %v788_v61 = vsel %vm775_vm2, %v2194_v28, %v1667_v36 }
  0xd2   : > { %v805_v28 = vsel %vm792_vm3, %v788_v61, %v1707_v23 }
  0xd3   : > { %v789_v25 = vsel %vm775_vm2, %v2202_v32, %v1668_v45  ;;  %v822_v20 = vsel %vm809_vm4, %v805_v28, %v1747_v9  ;;  %vm1384_vm2 = vcmask 1046534  }
  0xd4   : > { %v806_v7 = vsel %vm792_vm3, %v789_v25, %v1708_v14  ;;  %vm1386_vm3 = vcmask 1047559  }
  0xd5   : > { %v2559_v39 = vpop.permute.xlu2 %1825  ;;  %v823_v41 = vsel %vm809_vm4, %v806_v7, %v1748_v58 }
  0xd6   : > { %v2547_v1 = vpop.permute.xlu1 %1775 }
  0xd7   : > { %v1777_v13 = vunpack.i.l.bf16 %v2547_v1  ;;  %v1778_v58 = vunpack.i.h.bf16 %v2547_v1 }
  0xd8   : > { %v2549_v29 = vpop.permute.xlu0 %1770 }
  0xd9   : > { %v1772_v47 = vunpack.i.l.bf16 %v2549_v29  ;;  %v1773_v48 = vunpack.i.h.bf16 %v2549_v29  ;;  %v840_v14 = vsel %vm826_vm6, %v823_v41, %v1777_v13 }
  0xdb   : > { %v836_v32 = vsel %vm826_vm6, %v819_v19, %v1772_v47  ;;  %v839_v23 = vsel %vm826_vm6, %v822_v20, %v1773_v48  ;;  %v1767_v48 = vunpack.i.l.bf16 %v2469_v51 }
  0xdc   : > { %v853_v53 = vsel %vm843_vm7, %v836_v32, %v1783_v8  ;;  %v1728_v32 = vunpack.i.h.bf16 %v2500_v17 }
  0xdd   : > { %v2591_v6 = vpop.permute.xlu2 %1840 }
  0xde   : > { %v1791_v54 = vpop.permute.xlu1 %1790  ;;  %v1843_v51 = vunpack.i.h.bf16 %v2591_v6 }
  0xdf   : > { %v1793_v31 = vunpack.i.h.bf16 %v1791_v54  ;;  %v1792_v0 = vunpack.i.l.bf16 %v1791_v54 }
  0xe0   : > { %v1786_v11 = vpop.permute.xlu0 %1785 }
  0xe1   : > { %v869_v46 = vsel %vm860_vm8, %v852_v56, %v1792_v0  ;;  %v870_v63 = vsel %vm860_vm8, %v853_v53, %v1793_v31  ;;  %v1788_v55 = vunpack.i.h.bf16 %v1786_v11  ;;  %v1787_v36 = vunpack.i.l.bf16 %v1786_v11 }
  0xe2   : > { %v1727_v31 = vunpack.i.l.bf16 %v2500_v17  ;;  %v1757_v0 = vunpack.i.l.bf16 %v2535_v24  ;;  %v1758_v56 = vunpack.i.h.bf16 %v2535_v24  ;;  %v815_v53 = vsel %vm809_vm4, %v2429_v43, %v1728_v32 }
  0xe3   : > { %v856_v11 = vsel %vm843_vm7, %v839_v23, %v1787_v36  ;;  %v857_v61 = vsel %vm843_vm7, %v840_v14, %v1788_v55  ;;  %v832_v1 = vsel %vm826_vm6, %v815_v53, %v1778_v58 }
  0xe4   : > { %v873_v3 = vsel %vm860_vm8, %v856_v11, %v1797_v57  ;;  %v874_v47 = vsel %vm860_vm8, %v857_v61, %v1798_v27  ;;  %v814_v17 = vsel %vm809_vm4, %v2426_v40, %v1727_v31  ;;  %v828_v24 = vsel %vm826_vm6, %v2477_v52, %v1758_v56 }
  0xe5   : > { %v1856_v15 = vpop.permute.xlu2 %1855  ;;  %v831_v52 = vsel %vm826_vm6, %v814_v17, %v1767_v48 }
  0xe6   : > { %v1806_v18 = vpop.permute.xlu1 %1805 }
  0xe7   : > { %v1808_v33 = vunpack.i.h.bf16 %v1806_v18  ;;  %v1807_v34 = vunpack.i.l.bf16 %v1806_v18 }
  0xe8   : > { %v1801_v12 = vpop.permute.xlu0 %1800 }
  0xe9   : > { %v1803_v10 = vunpack.i.h.bf16 %v1801_v12  ;;  %v1802_v62 = vunpack.i.l.bf16 %v1801_v12  ;;  %v890_v49 = vsel %vm877_vm9, %v873_v3, %v1807_v34  ;;  %v891_v28 = vsel %vm877_vm9, %v874_v47, %v1808_v33 }
  0xeb   : > { %v886_v45 = vsel %vm877_vm9, %v869_v46, %v1802_v62  ;;  %v887_v29 = vsel %vm877_vm9, %v870_v63, %v1803_v10  ;;  %v827_v10 = vsel %vm826_vm6, %v2473_v50, %v1757_v0  ;;  %v1828_v62 = vunpack.i.h.bf16 %v2559_v39 }
  0xec   : > { %v903_v54 = vsel %vm894_vm10, %v886_v45, %v1812_v26  ;;  %v904_v42 = vsel %vm894_vm10, %v887_v29, %v1813_v37  ;;  %v1827_v46 = vunpack.i.l.bf16 %v2559_v39  ;;  %v1842_v63 = vunpack.i.l.bf16 %v2591_v6 }
  0xed   : > { %v915_v16 = vpack.c.bf16 %v904_v42, %v903_v54  ;;  %v1871_v55 = vpop.permute.xlu2 %1870  ;;  %v849_v29 = vsel %vm843_vm7, %v832_v1, %v1828_v62  ;;  %v1858_v54 = vunpack.i.h.bf16 %v1856_v15  ;;  %v1857_v42 = vunpack.i.l.bf16 %v1856_v15 }
  0xee   : > { %v1821_v4 = vpop.permute.xlu1 %1820  ;;  %v848_v39 = vsel %vm843_vm7, %v831_v52, %v1827_v46  ;;  %v1872_v56 = vunpack.i.l.bf16 %v1871_v55 }
  0xef   : > { %1535 = vmatmul.msk.bf16.vlgmr.msra.gmra.mxu2 %vm959_vm11, %v915_v16  ;;  %v1823_v9 = vunpack.i.h.bf16 %v1821_v4  ;;  %v1822_v37 = vunpack.i.l.bf16 %v1821_v4 }
  0xf0   : > { %v1816_v25 = vpop.permute.xlu0 %1815 }
  0xf1   : > { %v1818_v59 = vunpack.i.h.bf16 %v1816_v25  ;;  %v1817_v21 = vunpack.i.l.bf16 %v1816_v25  ;;  %v844_v43 = vsel %vm843_vm7, %v827_v10, %v1822_v37  ;;  %v845_v40 = vsel %vm843_vm7, %v828_v24, %v1823_v9 }
  0xf3   : > { %v907_v8 = vsel %vm894_vm10, %v890_v49, %v1817_v21  ;;  %v908_v7 = vsel %vm894_vm10, %v891_v28, %v1818_v59 }
  0xf4   : > { %v917_v19 = vpack.c.bf16 %v908_v7, %v907_v8 }
  0xf5   : > { %v1886_v15 = vpop.permute.xlu2 %1885 }
  0xf6   : > { %1537 = vmatmul.msk.bf16.vlgmr.msra.gmra.mxu3 %vm959_vm11, %v917_v19  ;;  %v1836_v18 = vpop.permute.xlu1 %1835 }
  0xf7   : > { %v1838_v20 = vunpack.i.h.bf16 %v1836_v18  ;;  %v1837_v27 = vunpack.i.l.bf16 %v1836_v18  ;;  %v1873_v18 = vunpack.i.h.bf16 %v1871_v55 }
  0xf8   : > { %v1831_v26 = vpop.permute.xlu0 %1830 }
  0xf9   : > { %v1833_v13 = vunpack.i.h.bf16 %v1831_v26  ;;  %v1832_v12 = vunpack.i.l.bf16 %v1831_v26  ;;  %v865_v34 = vsel %vm860_vm8, %v848_v39, %v1837_v27  ;;  %v866_v4 = vsel %vm860_vm8, %v849_v29, %v1838_v20 }
  0xfa   : > { %v1887_v20 = vunpack.i.l.bf16 %v1886_v15 }
  0xfb   : > { %v861_v50 = vsel %vm860_vm8, %v844_v43, %v1832_v12  ;;  %v862_v36 = vsel %vm860_vm8, %v845_v40, %v1833_v13 }
  0xfc   : > { %v878_v14 = vsel %vm877_vm9, %v861_v50, %v1842_v63  ;;  %v879_v23 = vsel %vm877_vm9, %v862_v36, %v1843_v51  ;;  %v1888_v50 = vunpack.i.h.bf16 %v1886_v15 }
  0xfd   : > { %v1901_v32 = vpop.permute.xlu2 %1900 }
  0xfe   : > { %v1851_v45 = vpop.permute.xlu1 %1850  ;;  %v1903_v12 = vunpack.i.h.bf16 %v1901_v32  ;;  %v1902_v48 = vunpack.i.l.bf16 %v1901_v32 }
  0xff   : > { %v1853_v41 = vunpack.i.h.bf16 %v1851_v45  ;;  %v1852_v6 = vunpack.i.l.bf16 %v1851_v45 }
 0x100   : > { %v1846_v57 = vpop.permute.xlu0 %1845 }
 0x101   : > { %v1848_v16 = vunpack.i.h.bf16 %v1846_v57  ;;  %v1847_v11 = vunpack.i.l.bf16 %v1846_v57  ;;  %v895_v61 = vsel %vm894_vm10, %v878_v14, %v1852_v6  ;;  %v896_v33 = vsel %vm894_vm10, %v879_v23, %v1853_v41 }
 0x102   : > { %v911_v25 = vpack.c.bf16 %v896_v33, %v895_v61 }
 0x103   : > { %v882_v3 = vsel %vm877_vm9, %v865_v34, %v1847_v11  ;;  %v883_v47 = vsel %vm877_vm9, %v866_v4, %v1848_v16 }
 0x104   : > { %1531 = vmatmul.msk.bf16.vlgmr.msra.gmra.mxu0 %vm959_vm11, %v911_v25  ;;  %v899_v59 = vsel %vm894_vm10, %v882_v3, %v1857_v42  ;;  %v900_v21 = vsel %vm894_vm10, %v883_v47, %v1858_v54 }
 0x105   : > { %v913_v49 = vpack.c.bf16 %v900_v21, %v899_v59  ;;  %v1916_v43 = vpop.permute.xlu2 %1915 }
 0x106   : > { %v1866_v28 = vpop.permute.xlu1 %1865  ;;  %v1918_v47 = vunpack.i.h.bf16 %v1916_v43  ;;  %v1917_v59 = vunpack.i.l.bf16 %v1916_v43 }
 0x107   : > { %1533 = vmatmul.msk.bf16.vlgmr.msra.gmra.mxu1 %vm959_vm11, %v913_v49  ;;  %v1868_v53 = vunpack.i.h.bf16 %v1866_v28  ;;  %v1867_v17 = vunpack.i.l.bf16 %v1866_v28 }
 0x108   : > { %v1861_v8 = vpop.permute.xlu0 %1860  ;;  %v846_v15 = vsel %vm843_vm7, %v2539_v30, %v1917_v59 }
 0x109   : > { %v1863_v31 = vunpack.i.h.bf16 %v1861_v8  ;;  %v1862_v0 = vunpack.i.l.bf16 %v1861_v8  ;;  %v841_v27 = vsel %vm826_vm6, %v2490_v38, %v1867_v17  ;;  %v842_v45 = vsel %vm826_vm6, %v2493_v2, %v1868_v53 }
 0x10a   : > { %v847_v8 = vsel %vm843_vm7, %v2543_v35, %v1918_v47 }
 0x10b   : > { %v837_v58 = vsel %vm826_vm6, %v2533_v5, %v1862_v0  ;;  %v838_v9 = vsel %vm826_vm6, %v2529_v44, %v1863_v31 }
 0x10c   : > { %v854_v24 = vsel %vm843_vm7, %v837_v58, %v1872_v56  ;;  %v855_v1 = vsel %vm843_vm7, %v838_v9, %v1873_v18 }
 0x10d   : > { %v1931_v34 = vpop.permute.xlu2 %1930 }
 0x10e   : > { %v1881_v7 = vpop.permute.xlu1 %1880 }
 0x10f   : > { %v1883_v37 = vunpack.i.h.bf16 %v1881_v7  ;;  %v1882_v26 = vunpack.i.l.bf16 %v1881_v7 }
 0x110   : > { %v1876_v19 = vpop.permute.xlu0 %1875 }
 0x111   : > { %v871_v51 = vsel %vm860_vm8, %v854_v24, %v1882_v26  ;;  %v872_v5 = vsel %vm860_vm8, %v855_v1, %v1883_v37  ;;  %v1878_v63 = vunpack.i.h.bf16 %v1876_v19  ;;  %v1877_v44 = vunpack.i.l.bf16 %v1876_v19 }
 0x112   : > { %v1932_v24 = vunpack.i.l.bf16 %v1931_v34 }
 0x113   : > { %v858_v29 = vsel %vm843_vm7, %v841_v27, %v1877_v44  ;;  %v859_v41 = vsel %vm843_vm7, %v842_v45, %v1878_v63 }
 0x114   : > { %v875_v14 = vsel %vm860_vm8, %v858_v29, %v1887_v20  ;;  %v876_v23 = vsel %vm860_vm8, %v859_v41, %v1888_v50 }
 0x115   : > { %v1946_v21 = vpop.permute.xlu2 %1945 }
 0x116   : > { %v1896_v13 = vpop.permute.xlu1 %1895  ;;  %v1948_v19 = vunpack.i.h.bf16 %v1946_v21  ;;  %v1947_v32 = vunpack.i.l.bf16 %v1946_v21 }
 0x117   : > { %v1898_v6 = vunpack.i.h.bf16 %v1896_v13  ;;  %v1897_v54 = vunpack.i.l.bf16 %v1896_v13 }
 0x118   : > { %v1891_v10 = vpop.permute.xlu0 %1890 }
 0x119   : > { %v1893_v62 = vunpack.i.h.bf16 %v1891_v10  ;;  %v1892_v46 = vunpack.i.l.bf16 %v1891_v10  ;;  %v892_v11 = vsel %vm877_vm9, %v875_v14, %v1897_v54  ;;  %v893_v2 = vsel %vm877_vm9, %v876_v23, %v1898_v6 }
 0x11b   : > { %v888_v40 = vsel %vm877_vm9, %v871_v51, %v1892_v46  ;;  %v889_v55 = vsel %vm877_vm9, %v872_v5, %v1893_v62 }
 0x11c   : > { %v905_v36 = vsel %vm894_vm10, %v888_v40, %v1902_v48  ;;  %v906_v52 = vsel %vm894_vm10, %v889_v55, %v1903_v12  ;;  %v1933_v48 = vunpack.i.h.bf16 %v1931_v34 }
 0x11d   : > { %v916_v39 = vpack.c.bf16 %v906_v52, %v905_v36 }
 0x11e   : > { %v1911_v42 = vpop.permute.xlu1 %1910 }
 0x11f   : > { %1536 = vmatmul.msk.bf16.gmra.mxu2 %vm959_vm11, %v916_v39  ;;  %v1913_v31 = vunpack.i.h.bf16 %v1911_v42  ;;  %v1912_v0 = vunpack.i.l.bf16 %v1911_v42  ;;  %v2706_v39 = vld [vmem:[%s2856_s2] ss:$0 sm:$0xff] }
 0x120   : > { %v1906_v57 = vpop.permute.xlu0 %1905 }
 0x121   : > { %v1908_v16 = vunpack.i.h.bf16 %v1906_v57  ;;  %v1907_v38 = vunpack.i.l.bf16 %v1906_v57  ;;  %v833_v17 = vsel %vm826_vm6, %v2504_v60, %v1912_v0  ;;  %v834_v10 = vsel %vm826_vm6, %v2508_v22, %v1913_v31 }
 0x123   : > { %v909_v61 = vsel %vm894_vm10, %v892_v11, %v1907_v38  ;;  %v910_v33 = vsel %vm894_vm10, %v893_v2, %v1908_v16 }
 0x124   : > { %v918_v4 = vpack.c.bf16 %v910_v33, %v909_v61 }
 0x126   : > { %1538 = vmatmul.msk.bf16.gmra.mxu3 %vm959_vm11, %v918_v4  ;;  %v1926_v3 = vpop.permute.xlu1 %1925 }
 0x127   : > { %v1928_v49 = vunpack.i.h.bf16 %v1926_v3  ;;  %v1927_v28 = vunpack.i.l.bf16 %v1926_v3 }
 0x128   : > { %v1921_v25 = vpop.permute.xlu0 %1920 }
 0x129   : > { %v863_v58 = vsel %vm860_vm8, %v846_v15, %v1927_v28  ;;  %v864_v9 = vsel %vm860_vm8, %v847_v8, %v1928_v49  ;;  %v1923_v37 = vunpack.i.h.bf16 %v1921_v25  ;;  %v1922_v26 = vunpack.i.l.bf16 %v1921_v25 }
 0x12b   : > { %v851_v62 = vsel %vm843_vm7, %v834_v10, %v1923_v37  ;;  %v850_v46 = vsel %vm843_vm7, %v833_v17, %v1922_v26 }
 0x12c   : > { %v867_v44 = vsel %vm860_vm8, %v850_v46, %v1932_v24  ;;  %v868_v43 = vsel %vm860_vm8, %v851_v62, %v1933_v48 }
 0x12e   : > { %v1941_v13 = vpop.permute.xlu1 %1940 }
 0x12f   : > { %v1943_v51 = vunpack.i.h.bf16 %v1941_v13  ;;  %v1942_v5 = vunpack.i.l.bf16 %v1941_v13 }
 0x130   : > { %v1936_v7 = vpop.permute.xlu0 %1935 }
 0x131   : > { %v1938_v18 = vunpack.i.h.bf16 %v1936_v7  ;;  %v1937_v56 = vunpack.i.l.bf16 %v1936_v7  ;;  %v884_v55 = vsel %vm877_vm9, %v867_v44, %v1942_v5  ;;  %v885_v22 = vsel %vm877_vm9, %v868_v43, %v1943_v51 }
 0x133   : > { %v880_v12 = vsel %vm877_vm9, %v863_v58, %v1937_v56  ;;  %v881_v30 = vsel %vm877_vm9, %v864_v9, %v1938_v18 }
 0x134   : > { %v897_v35 = vsel %vm894_vm10, %v880_v12, %v1947_v32  ;;  %v898_v53 = vsel %vm894_vm10, %v881_v30, %v1948_v19 }
 0x135   : > { %v912_v1 = vpack.c.bf16 %v898_v53, %v897_v35 }
 0x137   : > { %1532 = vmatmul.msk.bf16.gmra.mxu0 %vm959_vm11, %v912_v1 }
 0x138   : > { %v1951_v63 = vpop.permute.xlu0 %1950 }
 0x139   : > { %v1953_v40 = vunpack.i.h.bf16 %v1951_v63  ;;  %v1952_v60 = vunpack.i.l.bf16 %v1951_v63 }
 0x13b   : > { %v901_v50 = vsel %vm894_vm10, %v884_v55, %v1952_v60  ;;  %v902_v36 = vsel %vm894_vm10, %v885_v22, %v1953_v40 }
 0x13c   : > { %v914_v52 = vpack.c.bf16 %v902_v36, %v901_v50 }
 0x13e   : > { %1534 = vmatmul.msk.bf16.gmra.mxu1 %vm959_vm11, %v914_v52 }
 0x172   : > { %v1017_v20 = vpop.f32.mrf.mxu2 }
 0x173   : > { %v1018_v41 = vadd.f32 %v2706_v39, %v1017_v20 }
 0x175   : > { %v1045_v38 = vmax.f32 %v1018_v41, 0.0 }
 0x179   : > { %v1027_v27 = vpop.f32.mrf.mxu3 }
 0x17a   : > { %v1019_v45 = vpop.f32.mrf.mxu2  ;;  %v1028_v14 = vadd.f32 %v2706_v39, %v1027_v27 }
 0x17b   : > { %v1020_v23 = vadd.f32 %v2706_v39, %v1019_v45 }
 0x17c   : > { %v1049_v34 = vmax.f32 %v1028_v14, 0.0 }
 0x17d   : > { %v1046_v4 = vmax.f32 %v1020_v23, 0.0 }
 0x181   : > { %v997_v29 = vpop.f32.mrf.mxu0  ;;  %v1029_v6 = vpop.f32.mrf.mxu3 }
 0x182   : > { %v2713_v16 = vadd.f32 %v2706_v39, %v1029_v6  ;;  %v2716_v2 = vadd.f32 %v2706_v39, %v997_v29 }
 0x184   : > { %v1007_v42 = vpop.f32.mrf.mxu1  ;;  %v1050_v25 = vmax.f32 %v2713_v16, 0.0  ;;  %v1037_v28 = vmax.f32 %v2716_v2, 0.0 }
 0x185   : > { %v2719_v61 = vadd.f32 %v2706_v39, %v1007_v42 }
 0x187   : > { %v1041_v15 = vmax.f32 %v2719_v61, 0.0 }
 0x189   : > { %v999_v8 = vpop.f32.mrf.mxu0 }
 0x18a   : > { %v2731_v13 = vadd.f32 %v2706_v39, %v999_v8 }
 0x18c   : > { %v2740_v8 = vpop.f32.mrf.mxu1 }
 0x1a2   : > { %v1022_v54 = vpop.f32.mrf.mxu2 }
 0x1a3   : > { %v1023_v57 = vadd.f32 %v2706_v39, %v1022_v54 }
 0x1a5   : > { %v1047_v11 = vmax.f32 %v1023_v57, 0.0 }
 0x1a7   : > { %v1057_v33 = vmax.f32 %v1045_v38, %v1047_v11 }
 0x1a9   : > { %v1081_v3 = vrot.slane %v1057_v33, 2  ;;  %v1082_v47 = vrot.slane %v1057_v33, 4  ;;  %v1083_v59 = vrot.slane %v1057_v33, 6  ;;  %v1230_v21 = vsel %vm1117_vm12, %v1057_v33, -inf  ;;  %v1032_v49 = vpop.f32.mrf.mxu3 }
 0x1aa   : > { %v1231_v7 = vrot.slane %v1230_v21, 4  ;;  %v1033_v19 = vadd.f32 %v2706_v39, %v1032_v49  ;;  %v1024_v32 = vpop.f32.mrf.mxu2 }
 0x1ab   : > { %v1237_v31 = vsel %vm1117_vm12, %v1081_v3, -inf  ;;  %v1244_v0 = vsel %vm1117_vm12, %v1082_v47, -inf  ;;  %v1251_v18 = vsel %vm1117_vm12, %v1083_v59, -inf  ;;  %v1025_v56 = vadd.f32 %v2706_v39, %v1024_v32 }
 0x1ac   : > { %v1232_v58 = vmax.f32 %v1230_v21, %v1231_v7  ;;  %v1238_v9 = vrot.slane %v1237_v31, 4  ;;  %v1245_v37 = vrot.slane %v1244_v0, 4  ;;  %v1252_v26 = vrot.slane %v1251_v18, 4 }
 0x1ad   : > { %v1051_v12 = vmax.f32 %v1033_v19, 0.0  ;;  %v1048_v30 = vmax.f32 %v1025_v56, 0.0 }
 0x1ae   : > { %v1233_v48 = vrot.slane %v1232_v58, 2  ;;  %v1239_v35 = vmax.f32 %v1237_v31, %v1238_v9  ;;  %v1246_v53 = vmax.f32 %v1244_v0, %v1245_v37  ;;  %v1253_v17 = vmax.f32 %v1251_v18, %v1252_v26 }
 0x1af   : > { %v1059_v10 = vmax.f32 %v1049_v34, %v1051_v12  ;;  %v1058_v24 = vmax.f32 %v1046_v4, %v1048_v30 }
 0x1b0   : > { %v1234_v1 = vmax.f32 %v1232_v58, %v1233_v48  ;;  %v1240_v62 = vrot.slane %v1239_v35, 2  ;;  %v1247_v46 = vrot.slane %v1246_v53, 2  ;;  %v1254_v51 = vrot.slane %v1253_v17, 2 }
 0x1b1   : > { %v1087_v5 = vrot.slane %v1059_v10, 2  ;;  %v1088_v63 = vrot.slane %v1059_v10, 4  ;;  %v1089_v44 = vrot.slane %v1059_v10, 6  ;;  %v1286_v43 = vsel %vm1117_vm12, %v1059_v10, -inf }
 0x1b2   : > { %v1235_v40 = vrot.slane %v1234_v1, 1  ;;  %v1241_v60 = vmax.f32 %v1239_v35, %v1240_v62  ;;  %v1248_v55 = vmax.f32 %v1246_v53, %v1247_v46  ;;  %v1255_v22 = vmax.f32 %v1253_v17, %v1254_v51  ;;  %v1034_v17 = vpop.f32.mrf.mxu3 }
 0x1b3   : > { %v1287_v50 = vrot.slane %v1286_v43, 4  ;;  %v1293_v36 = vsel %vm1117_vm12, %v1087_v5, -inf  ;;  %v1300_v52 = vsel %vm1117_vm12, %v1088_v63, -inf  ;;  %v1307_v20 = vsel %vm1117_vm12, %v1089_v44, -inf }
 0x1b4   : > { %v1236_v27 = vmax.f32 %v1234_v1, %v1235_v40  ;;  %v1242_v45 = vrot.slane %v1241_v60, 1  ;;  %v1249_v29 = vrot.slane %v1248_v55, 1  ;;  %v1256_v41 = vrot.slane %v1255_v22, 1  ;;  %v1002_v44 = vpop.f32.mrf.mxu0 }
 0x1b5   : > { %v1288_v6 = vmax.f32 %v1286_v43, %v1287_v50  ;;  %v1294_v54 = vrot.slane %v1293_v36, 4  ;;  %v1301_v42 = vrot.slane %v1300_v52, 4  ;;  %v1308_v57 = vrot.slane %v1307_v20, 4 }
 0x1b6   : > { %v1243_v14 = vmax.f32 %v1241_v60, %v1242_v45  ;;  %v1250_v23 = vmax.f32 %v1248_v55, %v1249_v29  ;;  %v1257_v38 = vmax.f32 %v1255_v22, %v1256_v41  ;;  %v1084_v11 = vrot.slane %v1058_v24, 2 }
 0x1b7   : > { %v1289_v33 = vrot.slane %v1288_v6, 2  ;;  %v1295_v34 = vmax.f32 %v1293_v36, %v1294_v54  ;;  %v1302_v4 = vmax.f32 %v1300_v52, %v1301_v42  ;;  %v1309_v3 = vmax.f32 %v1307_v20, %v1308_v57 }
 0x1b8   : > { %v1395_v47 = vsel %vm1374_vm13, %v1243_v14, %v1236_v27  ;;  %v1085_v59 = vrot.slane %v1058_v24, 4  ;;  %v1086_v21 = vrot.slane %v1058_v24, 6  ;;  %v1258_v49 = vsel %vm1117_vm12, %v1058_v24, -inf }
 0x1b9   : > { %v1396_v7 = vsel %vm1376_vm14, %v1250_v23, %v1395_v47  ;;  %v1290_v19 = vmax.f32 %v1288_v6, %v1289_v33  ;;  %v1296_v32 = vrot.slane %v1295_v34, 2  ;;  %v1303_v31 = vrot.slane %v1302_v4, 2 }
 0x1ba   : > { %v2744_v0 = vsel %vm1378_vm15, %v1257_v38, %v1396_v7  ;;  %v1310_v18 = vrot.slane %v1309_v3, 2  ;;  %v1259_v56 = vrot.slane %v1258_v49, 4  ;;  %v1265_v58 = vsel %vm1117_vm12, %v1084_v11, -inf }
 0x1bb   : > { %v1291_v9 = vrot.slane %v1290_v19, 1  ;;  %v1297_v37 = vmax.f32 %v1295_v34, %v1296_v32  ;;  %v1304_v26 = vmax.f32 %v1302_v4, %v1303_v31  ;;  %v1266_v12 = vrot.slane %v1265_v58, 4  ;;  %v1012_v41 = vpop.f32.mrf.mxu1 }
 0x1bc   : > { %v1311_v30 = vmax.f32 %v1309_v3, %v1310_v18  ;;  %v1260_v48 = vmax.f32 %v1258_v49, %v1259_v56  ;;  %v1272_v35 = vsel %vm1117_vm12, %v1085_v59, -inf  ;;  %v1279_v53 = vsel %vm1117_vm12, %v1086_v21, -inf }
 0x1bd   : > { %v1292_v10 = vmax.f32 %v1290_v19, %v1291_v9  ;;  %v1298_v24 = vrot.slane %v1297_v37, 1  ;;  %v1305_v1 = vrot.slane %v1304_v26, 1  ;;  %v1267_v62 = vmax.f32 %v1265_v58, %v1266_v12 }
 0x1be   : > { %v1312_v46 = vrot.slane %v1311_v30, 1  ;;  %v1261_v51 = vrot.slane %v1260_v48, 2  ;;  %v1273_v5 = vrot.slane %v1272_v35, 4  ;;  %v1280_v63 = vrot.slane %v1279_v53, 4 }
 0x1bf   : > { %v1299_v43 = vmax.f32 %v1297_v37, %v1298_v24  ;;  %v1306_v40 = vmax.f32 %v1304_v26, %v1305_v1  ;;  %v1268_v60 = vrot.slane %v1267_v62, 2  ;;  %v1035_v55 = vadd.f32 %v2706_v39, %v1034_v17 }
 0x1c0   : > { %v1313_v22 = vmax.f32 %v1311_v30, %v1312_v46  ;;  %v1262_v50 = vmax.f32 %v1260_v48, %v1261_v51  ;;  %v1274_v36 = vmax.f32 %v1272_v35, %v1273_v5  ;;  %v1281_v52 = vmax.f32 %v1279_v53, %v1280_v63 }
 0x1c1   : > { %v1402_v20 = vsel %vm1374_vm13, %v1299_v43, %v1292_v10  ;;  %v1269_v27 = vmax.f32 %v1267_v62, %v1268_v60  ;;  %v1052_v45 = vmax.f32 %v1035_v55, 0.0  ;;  %v1003_v29 = vadd.f32 %v2706_v39, %v1002_v44 }
 0x1c2   : > { %v1403_v6 = vsel %vm1376_vm14, %v1306_v40, %v1402_v20  ;;  %v1263_v54 = vrot.slane %v1262_v50, 1  ;;  %v1275_v42 = vrot.slane %v1274_v36, 2  ;;  %v1282_v57 = vrot.slane %v1281_v52, 2 }
 0x1c3   : > { %v2765_v14 = vsel %vm1378_vm15, %v1313_v22, %v1403_v6  ;;  %v1270_v23 = vrot.slane %v1269_v27, 1  ;;  %v1060_v38 = vmax.f32 %v1050_v25, %v1052_v45  ;;  %v1039_v11 = vmax.f32 %v1003_v29, 0.0 }
 0x1c4   : > { %v1264_v33 = vmax.f32 %v1262_v50, %v1263_v54  ;;  %v1276_v34 = vmax.f32 %v1274_v36, %v1275_v42  ;;  %v1283_v4 = vmax.f32 %v1281_v52, %v1282_v57  ;;  %v2770_v3 = vadd.f32 %v2706_v39, %v1012_v41 }
 0x1c5   : > { %v1271_v47 = vmax.f32 %v1269_v27, %v1270_v23  ;;  %v1090_v59 = vrot.slane %v1060_v38, 2  ;;  %v1091_v21 = vrot.slane %v1060_v38, 4  ;;  %v1092_v49 = vrot.slane %v1060_v38, 6 }
 0x1c6   : > { %v1277_v7 = vrot.slane %v1276_v34, 1  ;;  %v1284_v19 = vrot.slane %v1283_v4, 1  ;;  %v1398_v32 = vsel %vm1380_vm0, %v1264_v33, %v2744_v0  ;;  %v1314_v16 = vsel %vm1117_vm12, %v1060_v38, -inf }
 0x1c7   : > { %v1399_v25 = vsel %vm1382_vm1, %v1271_v47, %v1398_v32  ;;  %v1315_v31 = vrot.slane %v1314_v16, 4  ;;  %v1321_v18 = vsel %vm1117_vm12, %v1090_v59, -inf  ;;  %v1328_v56 = vsel %vm1117_vm12, %v1091_v21, -inf }
 0x1c8   : > { %v1278_v58 = vmax.f32 %v1276_v34, %v1277_v7  ;;  %v1285_v9 = vmax.f32 %v1283_v4, %v1284_v19  ;;  %v1322_v37 = vrot.slane %v1321_v18, 4  ;;  %v1329_v26 = vrot.slane %v1328_v56, 4 }
 0x1c9   : > { %v1316_v0 = vmax.f32 %v1314_v16, %v1315_v31  ;;  %v1335_v12 = vsel %vm1117_vm12, %v1092_v49, -inf  ;;  %v1053_v30 = vmax.f32 %v1037_v28, %v1039_v11  ;;  %v1043_v48 = vmax.f32 %v2770_v3, 0.0 }
 0x1ca   : > { %v1400_v35 = vsel %vm1384_vm2, %v1278_v58, %v1399_v25  ;;  %v1323_v53 = vmax.f32 %v1321_v18, %v1322_v37  ;;  %v1330_v17 = vmax.f32 %v1328_v56, %v1329_v26  ;;  %v1336_v10 = vrot.slane %v1335_v12, 4 }
 0x1cb   : > { %v1401_v24 = vsel %vm1386_vm3, %v1285_v9, %v1400_v35  ;;  %v1317_v1 = vrot.slane %v1316_v0, 2  ;;  %v1069_v62 = vrot.slane %v1053_v30, 2  ;;  %v1070_v46 = vrot.slane %v1053_v30, 4 }
 0x1cc   : > { %1415 = vst [vmem:[%s2781_s30 + $0x10] sm:$0xff] %v1401_v24  ;;  %v1324_v51 = vrot.slane %v1323_v53, 2  ;;  %v1331_v5 = vrot.slane %v1330_v17, 2  ;;  %v1337_v63 = vmax.f32 %v1335_v12, %v1336_v10  ;;  %v1071_v44 = vrot.slane %v1053_v30, 6  ;;  %v1004_v12 = vpop.f32.mrf.mxu0 }
 0x1cd   : > { %v1318_v43 = vmax.f32 %v1316_v0, %v1317_v1  ;;  %v1118_v2 = vsel %vm1117_vm12, %v1053_v30, -inf  ;;  %v1125_v28 = vsel %vm1117_vm12, %v1069_v62, -inf  ;;  %v1132_v40 = vsel %vm1117_vm12, %v1070_v46, -inf  ;;  %v1014_v46 = vpop.f32.mrf.mxu1 }
 0x1ce   : > { %v1325_v60 = vmax.f32 %v1323_v53, %v1324_v51  ;;  %v1332_v55 = vmax.f32 %v1330_v17, %v1331_v5  ;;  %v1338_v22 = vrot.slane %v1337_v63, 2  ;;  %v1119_v50 = vrot.slane %v1118_v2, 4 }
 0x1cf   : > { %v1319_v36 = vrot.slane %v1318_v43, 1  ;;  %v1126_v52 = vrot.slane %v1125_v28, 4  ;;  %v1133_v20 = vrot.slane %v1132_v40, 4  ;;  %v1139_v27 = vsel %vm1117_vm12, %v1071_v44, -inf }
 0x1d0   : > { %v1326_v45 = vrot.slane %v1325_v60, 1  ;;  %v1333_v29 = vrot.slane %v1332_v55, 1  ;;  %v1339_v41 = vmax.f32 %v1337_v63, %v1338_v22  ;;  %v1120_v6 = vmax.f32 %v1118_v2, %v1119_v50 }
 0x1d1   : > { %v1320_v54 = vmax.f32 %v1318_v43, %v1319_v36  ;;  %v1127_v42 = vmax.f32 %v1125_v28, %v1126_v52  ;;  %v1134_v57 = vmax.f32 %v1132_v40, %v1133_v20  ;;  %v1140_v23 = vrot.slane %v1139_v27, 4 }
 0x1d2   : > { %v1327_v38 = vmax.f32 %v1325_v60, %v1326_v45  ;;  %v1334_v11 = vmax.f32 %v1332_v55, %v1333_v29  ;;  %v1340_v33 = vrot.slane %v1339_v41, 1  ;;  %v1121_v34 = vrot.slane %v1120_v6, 2 }
 0x1d3   : > { %v1405_v4 = vsel %vm1380_vm0, %v1320_v54, %v2765_v14  ;;  %v1128_v3 = vrot.slane %v1127_v42, 2  ;;  %v1135_v47 = vrot.slane %v1134_v57, 2  ;;  %v1141_v59 = vmax.f32 %v1139_v27, %v1140_v23 }
 0x1d4   : > { %v1341_v21 = vmax.f32 %v1339_v41, %v1340_v33  ;;  %v1406_v49 = vsel %vm1382_vm1, %v1327_v38, %v1405_v4  ;;  %v1122_v7 = vmax.f32 %v1120_v6, %v1121_v34  ;;  %v1055_v19 = vmax.f32 %v1041_v15, %v1043_v48 }
 0x1d5   : > { %v1407_v32 = vsel %vm1384_vm2, %v1334_v11, %v1406_v49  ;;  %v1129_v16 = vmax.f32 %v1127_v42, %v1128_v3  ;;  %v1136_v25 = vmax.f32 %v1134_v57, %v1135_v47  ;;  %v1142_v31 = vrot.slane %v1141_v59, 2 }
 0x1d6   : > { %v1408_v18 = vsel %vm1386_vm3, %v1341_v21, %v1407_v32  ;;  %v1123_v56 = vrot.slane %v1122_v7, 1  ;;  %v1075_v14 = vrot.slane %v1055_v19, 2  ;;  %v1076_v58 = vrot.slane %v1055_v19, 4 }
 0x1d7   : > { %1416 = vst [vmem:[%s2781_s30 + $0x18] sm:$0xff] %v1408_v18  ;;  %v1130_v9 = vrot.slane %v1129_v16, 1  ;;  %v1137_v37 = vrot.slane %v1136_v25, 1  ;;  %v1143_v26 = vmax.f32 %v1141_v59, %v1142_v31  ;;  %v1077_v0 = vrot.slane %v1055_v19, 6 }
 0x1d8   : > { %v1174_v30 = vsel %vm1117_vm12, %v1055_v19, -inf  ;;  %v1181_v61 = vsel %vm1117_vm12, %v1075_v14, -inf  ;;  %v1188_v15 = vsel %vm1117_vm12, %v1076_v58, -inf  ;;  %v1038_v48 = vmax.f32 %v2731_v13, 0.0 }
 0x1d9   : > { %v1124_v35 = vmax.f32 %v1122_v7, %v1123_v56  ;;  %v1131_v53 = vmax.f32 %v1129_v16, %v1130_v9  ;;  %v1175_v17 = vrot.slane %v1174_v30, 4  ;;  %v1182_v10 = vrot.slane %v1181_v61, 4 }
 0x1da   : > { %v1189_v24 = vrot.slane %v1188_v15, 4  ;;  %v1195_v1 = vsel %vm1117_vm12, %v1077_v0, -inf  ;;  %v1005_v62 = vadd.f32 %v2706_v39, %v1004_v12  ;;  %v1138_v51 = vmax.f32 %v1136_v25, %v1137_v37 }
 0x1db   : > { %v1144_v5 = vrot.slane %v1143_v26, 1  ;;  %v1176_v63 = vmax.f32 %v1174_v30, %v1175_v17  ;;  %v1196_v44 = vrot.slane %v1195_v1, 4  ;;  %v1375_v43 = vsel %vm1374_vm13, %v1131_v53, %v1124_v35 }
 0x1dc   : > { %v1183_v2 = vmax.f32 %v1181_v61, %v1182_v10  ;;  %v1190_v28 = vmax.f32 %v1188_v15, %v1189_v24  ;;  %v1040_v40 = vmax.f32 %v1005_v62, 0.0  ;;  %v1015_v55 = vadd.f32 %v2706_v39, %v1014_v46 }
 0x1dd   : > { %v1177_v13 = vrot.slane %v1176_v63, 2  ;;  %v1197_v60 = vmax.f32 %v1195_v1, %v1196_v44  ;;  %v1010_v22 = vadd.f32 %v2706_v39, %v2740_v8  ;;  %v1145_v20 = vmax.f32 %v1143_v26, %v1144_v5 }
 0x1de   : > { %v1184_v50 = vrot.slane %v1183_v2, 2  ;;  %v1191_v36 = vrot.slane %v1190_v28, 2  ;;  %v1054_v52 = vmax.f32 %v1038_v48, %v1040_v40  ;;  %v1377_v27 = vsel %vm1376_vm14, %v1138_v51, %v1375_v43 }
 0x1df   : > { %v1178_v45 = vmax.f32 %v1176_v63, %v1177_v13  ;;  %v1198_v29 = vrot.slane %v1197_v60, 2  ;;  %v1044_v11 = vmax.f32 %v1015_v55, 0.0  ;;  %v1042_v4 = vmax.f32 %v1010_v22, 0.0 }
 0x1e0   : > { %v1185_v41 = vmax.f32 %v1183_v2, %v1184_v50  ;;  %v1192_v6 = vmax.f32 %v1190_v28, %v1191_v36  ;;  %v1072_v54 = vrot.slane %v1054_v52, 2  ;;  %v1073_v42 = vrot.slane %v1054_v52, 4 }
 0x1e1   : > { %v1179_v57 = vrot.slane %v1178_v45, 1  ;;  %v1074_v23 = vrot.slane %v1054_v52, 6  ;;  %v1146_v38 = vsel %vm1117_vm12, %v1054_v52, -inf  ;;  %v2814_v34 = vmax.f32 %v1197_v60, %v1198_v29 }
 0x1e2   : > { %v1186_v33 = vrot.slane %v1185_v41, 1  ;;  %v1147_v39 = vrot.slane %v1146_v38, 4  ;;  %v1153_v8 = vsel %vm1117_vm12, %v1072_v54, -inf  ;;  %v1193_v3 = vrot.slane %v1192_v6, 1 }
 0x1e3   : > { %v1154_v47 = vrot.slane %v1153_v8, 4  ;;  %v1160_v59 = vsel %vm1117_vm12, %v1073_v42, -inf  ;;  %v1379_v21 = vsel %vm1378_vm15, %v1145_v20, %v1377_v27  ;;  %v1180_v32 = vmax.f32 %v1178_v45, %v1179_v57 }
 0x1e4   : > { %v1187_v49 = vmax.f32 %v1185_v41, %v1186_v33  ;;  %v1148_v7 = vmax.f32 %v1146_v38, %v1147_v39  ;;  %v1161_v19 = vrot.slane %v1160_v59, 4  ;;  %v1167_v25 = vsel %vm1117_vm12, %v1074_v23, -inf }
 0x1e5   : > { %v1155_v16 = vmax.f32 %v1153_v8, %v1154_v47  ;;  %v1056_v31 = vmax.f32 %v1042_v4, %v1044_v11  ;;  %v1200_v18 = vrot.slane %v2814_v34, 1  ;;  %v1168_v58 = vrot.slane %v1167_v25, 4 }
 0x1e6   : > { %v1149_v56 = vrot.slane %v1148_v7, 2  ;;  %v1162_v14 = vmax.f32 %v1160_v59, %v1161_v19  ;;  %v1194_v9 = vmax.f32 %v1192_v6, %v1193_v3  ;;  %v1388_v12 = vsel %vm1374_vm13, %v1187_v49, %v1180_v32 }
 0x1e7   : > { %v1156_v37 = vrot.slane %v1155_v16, 2  ;;  %v1078_v26 = vrot.slane %v1056_v31, 2  ;;  %v1079_v0 = vrot.slane %v1056_v31, 4  ;;  %v1169_v15 = vmax.f32 %v1167_v25, %v1168_v58 }
 0x1e8   : > { %v1150_v30 = vmax.f32 %v1148_v7, %v1149_v56  ;;  %v1163_v61 = vrot.slane %v1162_v14, 2  ;;  %v1080_v35 = vrot.slane %v1056_v31, 6  ;;  %v1202_v53 = vsel %vm1117_vm12, %v1056_v31, -inf }
 0x1e9   : > { %v1157_v48 = vmax.f32 %v1155_v16, %v1156_v37  ;;  %v1209_v17 = vsel %vm1117_vm12, %v1078_v26, -inf  ;;  %v1170_v1 = vrot.slane %v1169_v15, 2  ;;  %v1203_v62 = vrot.slane %v1202_v53, 4 }
 0x1ea   : > { %v1151_v10 = vrot.slane %v1150_v30, 1  ;;  %v1164_v24 = vmax.f32 %v1162_v14, %v1163_v61  ;;  %v1210_v51 = vrot.slane %v1209_v17, 4  ;;  %v1216_v5 = vsel %vm1117_vm12, %v1079_v0, -inf }
 0x1eb   : > { %v1158_v46 = vrot.slane %v1157_v48, 1  ;;  %v1223_v63 = vsel %vm1117_vm12, %v1080_v35, -inf  ;;  %v1171_v2 = vmax.f32 %v1169_v15, %v1170_v1  ;;  %v1204_v28 = vmax.f32 %v1202_v53, %v1203_v62 }
 0x1ec   : > { %v1152_v44 = vmax.f32 %v1150_v30, %v1151_v10  ;;  %v1165_v43 = vrot.slane %v1164_v24, 1  ;;  %v1211_v13 = vmax.f32 %v1209_v17, %v1210_v51  ;;  %v1217_v60 = vrot.slane %v1216_v5, 4 }
 0x1ed   : > { %v1159_v40 = vmax.f32 %v1157_v48, %v1158_v46  ;;  %v1224_v55 = vrot.slane %v1223_v63, 4  ;;  %v1172_v50 = vrot.slane %v1171_v2, 1  ;;  %v1205_v52 = vrot.slane %v1204_v28, 2 }
 0x1ee   : > { %v1166_v22 = vmax.f32 %v1164_v24, %v1165_v43  ;;  %v1381_v36 = vsel %vm1380_vm0, %v1152_v44, %v1379_v21  ;;  %v1212_v27 = vrot.slane %v1211_v13, 2  ;;  %v1218_v45 = vmax.f32 %v1216_v5, %v1217_v60 }
 0x1ef   : > { %v1383_v20 = vsel %vm1382_vm1, %v1159_v40, %v1381_v36  ;;  %v1225_v29 = vmax.f32 %v1223_v63, %v1224_v55  ;;  %v1173_v41 = vmax.f32 %v1171_v2, %v1172_v50  ;;  %v1206_v54 = vmax.f32 %v1204_v28, %v1205_v52 }
 0x1f0   : > { %v1385_v6 = vsel %vm1384_vm2, %v1166_v22, %v1383_v20  ;;  %v1213_v42 = vmax.f32 %v1211_v13, %v1212_v27  ;;  %v1219_v57 = vrot.slane %v1218_v45, 2  ;;  %v1389_v38 = vsel %vm1376_vm14, %v1194_v9, %v1388_v12 }
 0x1f1   : > { %v1226_v23 = vrot.slane %v1225_v29, 2  ;;  %v1387_v11 = vsel %vm1386_vm3, %v1173_v41, %v1385_v6  ;;  %v1207_v33 = vrot.slane %v1206_v54, 1  ;;  %v1201_v39 = vmax.f32 %v2814_v34, %v1200_v18 }
 0x1f2   : > { %1413 = vst [vmem:[%s2781_s30] sm:$0xff] %v1387_v11  ;;  %v1214_v8 = vrot.slane %v1213_v42, 1  ;;  %v1220_v4 = vmax.f32 %v1218_v45, %v1219_v57 }
 0x1f3   : > { %v1227_v3 = vmax.f32 %v1225_v29, %v1226_v23  ;;  %v1208_v47 = vmax.f32 %v1206_v54, %v1207_v33  ;;  %v1390_v59 = vsel %vm1378_vm15, %v1201_v39, %v1389_v38 }
 0x1f4   : > { %v1215_v21 = vmax.f32 %v1213_v42, %v1214_v8  ;;  %v1221_v49 = vrot.slane %v1220_v4, 1 }
 0x1f5   : > { %v1228_v7 = vrot.slane %v1227_v3, 1  ;;  %v1391_v19 = vsel %vm1380_vm0, %v1208_v47, %v1390_v59 }
 0x1f6   : > { %v1222_v32 = vmax.f32 %v1220_v4, %v1221_v49  ;;  %v1392_v16 = vsel %vm1382_vm1, %v1215_v21, %v1391_v19 }
 0x1f7   : > { %v1229_v25 = vmax.f32 %v1227_v3, %v1228_v7 }
 0x1f8   : > { %v1393_v31 = vsel %vm1384_vm2, %v1222_v32, %v1392_v16 }
 0x1f9   : > { %v1394_v34 = vsel %vm1386_vm3, %v1229_v25, %v1393_v31 }
 0x1fa   : > { %1414 = vst [vmem:[%s2781_s30 + $0x8] sm:$0xff] %v1394_v34 }
 0x1fb PF: > { %s13_s16 = sadd.s32 1, %s1993_s16   ;;  %s2859_s12 = smov %s1985_s14 }
 0x1fc   : > { %p10_p7 = scmp.ge.s32.totalorder %s13_s16, 6   ;;  %s2860_s13 = smov %s1989_s15 }
 0x1fd   : > { %s2861_s14 = smov %s2864_s17  ;;  %s2862_s15 = smov %s2868_s18 }
 0x1fe   :  { %12 = sbr.rel (!%p10_p7) target bundleno = 3 (0x3), region = 63 }

</bundles_post_ra>
